<compile_context>
chip_gen: v7x
topology: tpu7x:2x2x1
jax: 0.10.0
libtpu: 0.0.40
codegen_flags: <defaults>
</compile_context>

<pallas_src>
import jax
import jax.numpy as jnp
from jax.experimental import pallas as pl
from jax.experimental.pallas import tpu as pltpu


def net_fwd_kernel(x_ref, w1_ref, b1_ref, w3_ref, b3_ref, am_ref, out_ref):
    # x_ref:  (TB, S) f32    w1_ref: (S, H) bf16   b1_ref: (1, H) f32
    # w3_ref: (H, A) bf16    b3_ref: (1, A) f32    am_ref: (A, M) bf16
    # out_ref:(TB, M) f32
    x = x_ref[...].astype(jnp.bfloat16)      # bf16 MXU inputs, f32 accumulation
    h = jnp.dot(x, w1_ref[...], preferred_element_type=jnp.float32) + b1_ref[...]
    h = jnp.tanh(h)
    h = jnp.tanh(h)                          # torch forward() applies tanh twice (kept for fidelity)
    h = h.astype(jnp.bfloat16)
    p = jnp.dot(h, w3_ref[...], preferred_element_type=jnp.float32) + b3_ref[...]
    p = p.astype(jnp.bfloat16)
    logits = jnp.dot(p, am_ref[...], preferred_element_type=jnp.float32)
    out_ref[...] = logits.astype(out_ref.dtype)


def _pick_batch_tile(B):
    """Batch tile: <=256 rows, multiple of 8 dividing B, >=2 grid steps if possible."""
    if B % 8 != 0:
        return B                      # single full-batch tile (full-dim block is always legal)
    tb = min(B, 256)
    if B > 8:
        tb = min(tb, B // 2)          # >= 2 grid steps -> both v7x TensorCores get work
    while tb > 8 and (B % tb != 0 or tb % 8 != 0):
        tb -= 8
    return max(tb, 8)


_BUFFERED = getattr(pl, "Buffered", None)


def _broadcast_spec(shape, single_buffer):
    """BlockSpec for a grid-invariant (broadcast) operand."""
    index_map = lambda i: (0, 0)
    if single_buffer and _BUFFERED is not None:
        try:
            # Block index never changes -> a second VMEM buffer is pure waste.
            return pl.BlockSpec(shape, index_map, pipeline_mode=_BUFFERED(1))
        except TypeError:
            pass
    return pl.BlockSpec(shape, index_map)


def net_forward(x, w1_t, b1, w3_t, b3, action_mappings, *, tb=None,
                single_buffer_weights=True):
    B, S = x.shape
    H = w1_t.shape[1]
    A = w3_t.shape[1]
    M = action_mappings.shape[1]

    # Weight-like operands stored in bf16 (no-op if callers already keep them bf16).
    w1_t = w1_t.astype(jnp.bfloat16)
    w3_t = w3_t.astype(jnp.bfloat16)
    action_mappings = action_mappings.astype(jnp.bfloat16)
    b1 = b1.astype(jnp.float32).reshape(1, H)
    b3 = b3.astype(jnp.float32).reshape(1, A)
    x = x.astype(jnp.float32)

    if tb is None:
        tb = _pick_batch_tile(B)
    assert B % tb == 0

    grid = (B // tb,)

    def build(single_buffer):
        nbuf = 1 if single_buffer else 2
        # Deliberate VMEM budget: weights (nbuf copies) + double-buffered x/out
        # tiles + f32 intermediates, x2 margin, floor 16 MiB, cap 64 MiB (v7x).
        weight_bytes = (S * H + H * A + A * M) * 2 + (H + A) * 4
        io_bytes = 2 * tb * S * 4 + 2 * tb * M * 4
        act_bytes = 4 * tb * max(H, A, M) * 4
        vmem_bytes = 2 * (nbuf * weight_bytes + io_bytes + act_bytes)
        vmem_bytes = min(max(vmem_bytes, 16 * 1024 * 1024), 64 * 1024 * 1024)

        return pl.pallas_call(
            net_fwd_kernel,
            out_shape=jax.ShapeDtypeStruct((B, M), jnp.float32),
            grid_spec=pltpu.PrefetchScalarGridSpec(
                num_scalar_prefetch=0,
                grid=grid,
                in_specs=[
                    pl.BlockSpec((tb, S), lambda i: (i, 0)),   # x: tiled over batch
                    _broadcast_spec((S, H), single_buffer),    # W1^T
                    _broadcast_spec((1, H), single_buffer),    # b1
                    _broadcast_spec((H, A), single_buffer),    # W3^T
                    _broadcast_spec((1, A), single_buffer),    # b3
                    _broadcast_spec((A, M), single_buffer),    # action_mappings
                ],
                out_specs=pl.BlockSpec((tb, M), lambda i: (i, 0)),
            ),
            compiler_params=pltpu.CompilerParams(
                dimension_semantics=("parallel",),
                vmem_limit_bytes=vmem_bytes,
            ),
        )(x, w1_t, b1, w3_t, b3, action_mappings)

    if single_buffer_weights:
        try:
            return jax.block_until_ready(build(True))
        except Exception:
            # pipeline_mode=pl.Buffered(1) unsupported on this build; default
            # double buffering only costs ~0.5 MB of extra VMEM here.
            pass
    return build(False)


def reference_forward(x, w1_bf, b1, w3_bf, b3, am_bf):
    # Pure-JAX reference mirroring the kernel's bf16-storage / f32-accumulate numerics.
    xb = x.astype(jnp.bfloat16).astype(jnp.float32)
    h = jnp.tanh(xb @ w1_bf.astype(jnp.float32) + b1)
    h = jnp.tanh(h)
    h = h.astype(jnp.bfloat16).astype(jnp.float32)
    p = h @ w3_bf.astype(jnp.float32) + b3
    p = p.astype(jnp.bfloat16).astype(jnp.float32)
    return p @ am_bf.astype(jnp.float32)


if __name__ == "__main__":
    # Small, deterministic problem sizes consistent with the module.
    B = 8          # batch
    S = 128        # state_size
    H = 896        # hidden (fixed by the module)
    A = 128        # action_mappings.shape[0] (number of raw actions)
    M = 256        # action_mappings.shape[1] (mapped action space)

    key = jax.random.PRNGKey(0)
    k_x, k_w1, k_b1, k_w3, k_b3, k_am = jax.random.split(key, 6)

    # PyTorch-Linear-style uniform(-1/sqrt(fan_in), 1/sqrt(fan_in)) init.
    lim1 = 1.0 / jnp.sqrt(jnp.float32(S))
    lim3 = 1.0 / jnp.sqrt(jnp.float32(H))

    x = jax.random.normal(k_x, (B, S), dtype=jnp.float32)
    w1_t = jax.random.uniform(k_w1, (S, H), jnp.float32, -lim1, lim1)   # W1^T
    b1 = jax.random.uniform(k_b1, (1, H), jnp.float32, -lim1, lim1)
    w3_t = jax.random.uniform(k_w3, (H, A), jnp.float32, -lim3, lim3)   # W3^T
    b3 = jax.random.uniform(k_b3, (1, A), jnp.float32, -lim3, lim3)
    action_mappings = jax.random.uniform(k_am, (A, M), jnp.float32, 0.0, 1.0)

    # Weights are *stored* in bf16 (halves weight DMA, native bf16 MXU path).
    w1_bf = w1_t.astype(jnp.bfloat16)
    w3_bf = w3_t.astype(jnp.bfloat16)
    am_bf = action_mappings.astype(jnp.bfloat16)

    logits = net_forward(x, w1_bf, b1, w3_bf, b3, am_bf)
    logits = jax.block_until_ready(logits)

    ref = reference_forward(x, w1_bf, b1, w3_bf, b3, am_bf)
    assert logits.shape == (B, M)
    # bf16 storage -> relaxed tolerance (the old f32 kernel used 1e-4).
    assert jnp.allclose(logits, ref, atol=2e-2, rtol=2e-2), "mismatch vs reference"

    # TODO(synk): choose_action (softmax * attention + Categorical sampling +
    # np.unique) is host-side stochastic post-processing, not a kernel op.
    print("KERNEL_OK")
</pallas_src>

<mosaic_0001>
module attributes {stable_mosaic.version = 11 : i64} {
  func.func @net_fwd_kernel(%arg0: i32, %arg1: memref<8x128xf32, #tpu.memory_space<vmem>>, %arg2: memref<128x896xbf16, #tpu.memory_space<vmem>>, %arg3: memref<1x896xf32, #tpu.memory_space<vmem>>, %arg4: memref<896x128xbf16, #tpu.memory_space<vmem>>, %arg5: memref<1x128xf32, #tpu.memory_space<vmem>>, %arg6: memref<128x256xbf16, #tpu.memory_space<vmem>>, %arg7: memref<8x256xf32, #tpu.memory_space<vmem>>) attributes {dimension_semantics = [#tpu.dimension_semantics<parallel>], iteration_bounds = array<i64: 1>, scalar_prefetch = 0 : i64, scratch_operands = 0 : i64, tpu.core_type = #tpu.core_type<tc>, window_params = [{transform_indices = @transform_0, window_bounds = array<i64: 8, 128>}, {pipeline_mode = #tpu.pipeline_mode<synchronous>, transform_indices = @transform_1, window_bounds = array<i64: 128, 896>}, {pipeline_mode = #tpu.pipeline_mode<synchronous>, transform_indices = @transform_2, window_bounds = array<i64: 1, 896>}, {pipeline_mode = #tpu.pipeline_mode<synchronous>, transform_indices = @transform_3, window_bounds = array<i64: 896, 128>}, {pipeline_mode = #tpu.pipeline_mode<synchronous>, transform_indices = @transform_4, window_bounds = array<i64: 1, 128>}, {pipeline_mode = #tpu.pipeline_mode<synchronous>, transform_indices = @transform_5, window_bounds = array<i64: 128, 256>}, {transform_indices = @transform_6, window_bounds = array<i64: 8, 256>}]} {
    %c0 = arith.constant 0 : index
    %c0_0 = arith.constant 0 : index
    %0 = vector.load %arg1[%c0, %c0_0] : memref<8x128xf32, #tpu.memory_space<vmem>>, vector<8x128xf32>
    %1 = arith.truncf %0 : vector<8x128xf32> to vector<8x128xbf16>
    %c0_1 = arith.constant 0 : index
    %c0_2 = arith.constant 0 : index
    %2 = vector.load %arg2[%c0_1, %c0_2] : memref<128x896xbf16, #tpu.memory_space<vmem>>, vector<128x896xbf16>
    %cst = arith.constant dense<0.000000e+00> : vector<8x896xf32>
    %3 = tpu.matmul %1, %2, %cst {dimension_numbers = #tpu.dot_dimension_numbers<[1], [0], [0], [1], [0, 0, 1, 1], [], []>} : vector<8x128xbf16>, vector<128x896xbf16>, vector<8x896xf32> -> vector<8x896xf32>
    %c0_3 = arith.constant 0 : index
    %c0_4 = arith.constant 0 : index
    %4 = vector.load %arg3[%c0_3, %c0_4] : memref<1x896xf32, #tpu.memory_space<vmem>>, vector<1x896xf32>
    %5 = vector.broadcast %4 : vector<1x896xf32> to vector<8x896xf32>
    %6 = arith.addf %3, %5 : vector<8x896xf32>
    %7 = math.tanh %6 : vector<8x896xf32>
    %8 = math.tanh %7 : vector<8x896xf32>
    %9 = arith.truncf %8 : vector<8x896xf32> to vector<8x896xbf16>
    %c0_5 = arith.constant 0 : index
    %c0_6 = arith.constant 0 : index
    %10 = vector.load %arg4[%c0_5, %c0_6] : memref<896x128xbf16, #tpu.memory_space<vmem>>, vector<896x128xbf16>
    %cst_7 = arith.constant dense<0.000000e+00> : vector<8x128xf32>
    %11 = tpu.matmul %9, %10, %cst_7 {dimension_numbers = #tpu.dot_dimension_numbers<[1], [0], [0], [1], [0, 0, 1, 1], [], []>} : vector<8x896xbf16>, vector<896x128xbf16>, vector<8x128xf32> -> vector<8x128xf32>
    %c0_8 = arith.constant 0 : index
    %c0_9 = arith.constant 0 : index
    %12 = vector.load %arg5[%c0_8, %c0_9] : memref<1x128xf32, #tpu.memory_space<vmem>>, vector<1x128xf32>
    %13 = vector.broadcast %12 : vector<1x128xf32> to vector<8x128xf32>
    %14 = arith.addf %11, %13 : vector<8x128xf32>
    %15 = arith.truncf %14 : vector<8x128xf32> to vector<8x128xbf16>
    %c0_10 = arith.constant 0 : index
    %c0_11 = arith.constant 0 : index
    %16 = vector.load %arg6[%c0_10, %c0_11] : memref<128x256xbf16, #tpu.memory_space<vmem>>, vector<128x256xbf16>
    %cst_12 = arith.constant dense<0.000000e+00> : vector<8x256xf32>
    %17 = tpu.matmul %15, %16, %cst_12 {dimension_numbers = #tpu.dot_dimension_numbers<[1], [0], [0], [1], [0, 0, 1, 1], [], []>} : vector<8x128xbf16>, vector<128x256xbf16>, vector<8x256xf32> -> vector<8x256xf32>
    %c0_13 = arith.constant 0 : index
    %c0_14 = arith.constant 0 : index
    %18 = vector.load %arg7[%c0_13, %c0_14] : memref<8x256xf32, #tpu.memory_space<vmem>>, vector<8x256xf32>
    tpu.vector_store %arg7[%c0_13, %c0_14], %17 {strides = array<i32>} : memref<8x256xf32, #tpu.memory_space<vmem>>, vector<8x256xf32>,
    return
  }
  func.func @transform_0(%arg0: i32) -> (i32, i32) {
    %c0_i32 = arith.constant 0 : i32
    %c0_i32_0 = arith.constant 0 : i32
    return %arg0, %c0_i32 : i32, i32
  }
  func.func @transform_1(%arg0: i32) -> (i32, i32) {
    %c0_i32 = arith.constant 0 : i32
    %c0_i32_0 = arith.constant 0 : i32
    %c0_i32_1 = arith.constant 0 : i32
    return %c0_i32, %c0_i32_0 : i32, i32
  }
  func.func @transform_2(%arg0: i32) -> (i32, i32) {
    %c0_i32 = arith.constant 0 : i32
    %c0_i32_0 = arith.constant 0 : i32
    %c0_i32_1 = arith.constant 0 : i32
    return %c0_i32, %c0_i32_0 : i32, i32
  }
  func.func @transform_3(%arg0: i32) -> (i32, i32) {
    %c0_i32 = arith.constant 0 : i32
    %c0_i32_0 = arith.constant 0 : i32
    %c0_i32_1 = arith.constant 0 : i32
    return %c0_i32, %c0_i32_0 : i32, i32
  }
  func.func @transform_4(%arg0: i32) -> (i32, i32) {
    %c0_i32 = arith.constant 0 : i32
    %c0_i32_0 = arith.constant 0 : i32
    %c0_i32_1 = arith.constant 0 : i32
    return %c0_i32, %c0_i32_0 : i32, i32
  }
  func.func @transform_5(%arg0: i32) -> (i32, i32) {
    %c0_i32 = arith.constant 0 : i32
    %c0_i32_0 = arith.constant 0 : i32
    %c0_i32_1 = arith.constant 0 : i32
    return %c0_i32, %c0_i32_0 : i32, i32
  }
  func.func @transform_6(%arg0: i32) -> (i32, i32) {
    %c0_i32 = arith.constant 0 : i32
    %c0_i32_0 = arith.constant 0 : i32
    return %arg0, %c0_i32 : i32, i32
  }
}

module attributes {stable_mosaic.version = 11 : i64} {
  func.func @net_fwd_kernel(%arg0: i32, %arg1: memref<8x128xf32, #tpu.memory_space<vmem>>, %arg2: memref<128x896xbf16, #tpu.memory_space<vmem>>, %arg3: memref<1x896xf32, #tpu.memory_space<vmem>>, %arg4: memref<896x128xbf16, #tpu.memory_space<vmem>>, %arg5: memref<1x128xf32, #tpu.memory_space<vmem>>, %arg6: memref<128x256xbf16, #tpu.memory_space<vmem>>, %arg7: memref<8x256xf32, #tpu.memory_space<vmem>>) attributes {dimension_semantics = [#tpu.dimension_semantics<parallel>], iteration_bounds = array<i64: 1>, scalar_prefetch = 0 : i64, scratch_operands = 0 : i64, tpu.core_type = #tpu.core_type<tc>, window_params = [{transform_indices = @transform_0, window_bounds = array<i64: 8, 128>}, {pipeline_mode = #tpu.pipeline_mode<synchronous>, transform_indices = @transform_1, window_bounds = array<i64: 128, 896>}, {pipeline_mode = #tpu.pipeline_mode<synchronous>, transform_indices = @transform_2, window_bounds = array<i64: 1, 896>}, {pipeline_mode = #tpu.pipeline_mode<synchronous>, transform_indices = @transform_3, window_bounds = array<i64: 896, 128>}, {pipeline_mode = #tpu.pipeline_mode<synchronous>, transform_indices = @transform_4, window_bounds = array<i64: 1, 128>}, {pipeline_mode = #tpu.pipeline_mode<synchronous>, transform_indices = @transform_5, window_bounds = array<i64: 128, 256>}, {transform_indices = @transform_6, window_bounds = array<i64: 8, 256>}]} {
    %c0 = arith.constant 0 : index
    %c0_0 = arith.constant 0 : index
    %0 = vector.load %arg1[%c0, %c0_0] : memref<8x128xf32, #tpu.memory_space<vmem>>, vector<8x128xf32>
    %1 = arith.truncf %0 : vector<8x128xf32> to vector<8x128xbf16>
    %c0_1 = arith.constant 0 : index
    %c0_2 = arith.constant 0 : index
    %2 = vector.load %arg2[%c0_1, %c0_2] : memref<128x896xbf16, #tpu.memory_space<vmem>>, vector<128x896xbf16>
    %cst = arith.constant dense<0.000000e+00> : vector<8x896xf32>
    %3 = tpu.matmul %1, %2, %cst {dimension_numbers = #tpu.dot_dimension_numbers<[1], [0], [0], [1], [0, 0, 1, 1], [], []>} : vector<8x128xbf16>, vector<128x896xbf16>, vector<8x896xf32> -> vector<8x896xf32>
    %c0_3 = arith.constant 0 : index
    %c0_4 = arith.constant 0 : index
    %4 = vector.load %arg3[%c0_3, %c0_4] : memref<1x896xf32, #tpu.memory_space<vmem>>, vector<1x896xf32>
    %5 = vector.broadcast %4 : vector<1x896xf32> to vector<8x896xf32>
    %6 = arith.addf %3, %5 : vector<8x896xf32>
    %7 = math.tanh %6 : vector<8x896xf32>
    %8 = math.tanh %7 : vector<8x896xf32>
    %9 = arith.truncf %8 : vector<8x896xf32> to vector<8x896xbf16>
    %c0_5 = arith.constant 0 : index
    %c0_6 = arith.constant 0 : index
    %10 = vector.load %arg4[%c0_5, %c0_6] : memref<896x128xbf16, #tpu.memory_space<vmem>>, vector<896x128xbf16>
    %cst_7 = arith.constant dense<0.000000e+00> : vector<8x128xf32>
    %11 = tpu.matmul %9, %10, %cst_7 {dimension_numbers = #tpu.dot_dimension_numbers<[1], [0], [0], [1], [0, 0, 1, 1], [], []>} : vector<8x896xbf16>, vector<896x128xbf16>, vector<8x128xf32> -> vector<8x128xf32>
    %c0_8 = arith.constant 0 : index
    %c0_9 = arith.constant 0 : index
    %12 = vector.load %arg5[%c0_8, %c0_9] : memref<1x128xf32, #tpu.memory_space<vmem>>, vector<1x128xf32>
    %13 = vector.broadcast %12 : vector<1x128xf32> to vector<8x128xf32>
    %14 = arith.addf %11, %13 : vector<8x128xf32>
    %15 = arith.truncf %14 : vector<8x128xf32> to vector<8x128xbf16>
    %c0_10 = arith.constant 0 : index
    %c0_11 = arith.constant 0 : index
    %16 = vector.load %arg6[%c0_10, %c0_11] : memref<128x256xbf16, #tpu.memory_space<vmem>>, vector<128x256xbf16>
    %cst_12 = arith.constant dense<0.000000e+00> : vector<8x256xf32>
    %17 = tpu.matmul %15, %16, %cst_12 {dimension_numbers = #tpu.dot_dimension_numbers<[1], [0], [0], [1], [0, 0, 1, 1], [], []>} : vector<8x128xbf16>, vector<128x256xbf16>, vector<8x256xf32> -> vector<8x256xf32>
    %c0_13 = arith.constant 0 : index
    %c0_14 = arith.constant 0 : index
    %18 = vector.load %arg7[%c0_13, %c0_14] : memref<8x256xf32, #tpu.memory_space<vmem>>, vector<8x256xf32>
    tpu.vector_store %arg7[%c0_13, %c0_14], %17 {strides = array<i32>} : memref<8x256xf32, #tpu.memory_space<vmem>>, vector<8x256xf32>,
    return
  }
  func.func @transform_0(%arg0: i32) -> (i32, i32) {
    %c0_i32 = arith.constant 0 : i32
    %c0_i32_0 = arith.constant 0 : i32
    return %arg0, %c0_i32 : i32, i32
  }
  func.func @transform_1(%arg0: i32) -> (i32, i32) {
    %c0_i32 = arith.constant 0 : i32
    %c0_i32_0 = arith.constant 0 : i32
    %c0_i32_1 = arith.constant 0 : i32
    return %c0_i32, %c0_i32_0 : i32, i32
  }
  func.func @transform_2(%arg0: i32) -> (i32, i32) {
    %c0_i32 = arith.constant 0 : i32
    %c0_i32_0 = arith.constant 0 : i32
    %c0_i32_1 = arith.constant 0 : i32
    return %c0_i32, %c0_i32_0 : i32, i32
  }
  func.func @transform_3(%arg0: i32) -> (i32, i32) {
    %c0_i32 = arith.constant 0 : i32
    %c0_i32_0 = arith.constant 0 : i32
    %c0_i32_1 = arith.constant 0 : i32
    return %c0_i32, %c0_i32_0 : i32, i32
  }
  func.func @transform_4(%arg0: i32) -> (i32, i32) {
    %c0_i32 = arith.constant 0 : i32
    %c0_i32_0 = arith.constant 0 : i32
    %c0_i32_1 = arith.constant 0 : i32
    return %c0_i32, %c0_i32_0 : i32, i32
  }
  func.func @transform_5(%arg0: i32) -> (i32, i32) {
    %c0_i32 = arith.constant 0 : i32
    %c0_i32_0 = arith.constant 0 : i32
    %c0_i32_1 = arith.constant 0 : i32
    return %c0_i32, %c0_i32_0 : i32, i32
  }
  func.func @transform_6(%arg0: i32) -> (i32, i32) {
    %c0_i32 = arith.constant 0 : i32
    %c0_i32_0 = arith.constant 0 : i32
    return %arg0, %c0_i32 : i32, i32
  }
}

</mosaic_0001>

<bundles_post_ra>
// kernel: tpu_custom_call.1
= control target key start
LH: loop header
LB: loop body
LE: loop exit
PB: predicated region body
PF: predicated region fallthrough
CT: control target
= control target key end

     0   :  { %11 = vsyncpa [#allocation3], 0  ;;  %s2143_s0 = inlined_call_operand.hbm [shape: f32[8,128], index: 0, kind: input, shape index: {}]   ;;  %s2144_s1 = inlined_call_operand.hbm [shape: bf16[128,896], index: 1, kind: input, shape index: {}]   ;;  %s2145_s2 = inlined_call_operand.vmem [shape: f32[1,896], index: 2, kind: input, shape index: {}]   ;;  %s2146_s3 = inlined_call_operand.hbm [shape: bf16[896,128], index: 3, kind: input, shape index: {}]   ;;  %s2147_s4 = inlined_call_operand.vmem [shape: f32[1,128], index: 4, kind: input, shape index: {}]   ;;  %s2148_s5 = inlined_call_operand.hbm [shape: bf16[128,256], index: 5, kind: input, shape index: {}]   ;;  %s2149_s6 = inlined_call_operand.hbm [shape: f32[8,256], index: 6, kind: output, shape index: {}]  }
   0x1   :  { %12 = vsyncpa [#allocation6], 0 }
   0x2   :  { %13 = vsyncpa [#allocation9], 0 }
   0x3   :  { %14 = vsyncpa [#allocation4], 0  ;;  %s1998_s21 = smov [#allocation5]   ;;  %s1880_s25 = scalar_lea.hbm %s2144_s1, 7168 }
   0x4   :  { %s30_s22 = sshll.u32 %s1998_s21, 4  ;;  %p1881_p0 = scmp.ne.s32.totalorder %s2144_s1, %s1880_s25  ;;  %s31_s22 = int_to_ptr.vmem [resolvable:$true] %s30_s22 }
   0x5   :  { %p1884_p1 = scmp.lt.u32.totalorder %s1880_s25, %s2144_s1 }
   0x7   :  { %p1886_p2 = pnand %p1884_p1, %p1881_p0 }
   0x9   :  { %1889 = shalt.err (!%p1886_p2)
}
   0xa   :  { %s1890_s30 = scalar_lea.vmem %s31_s22, 7168  ;;  %p1895_p4 = scmp.lt.s32.totalorder %s31_s22, %s31_s22 }
   0xb   :  { %p1891_p3 = scmp.ne.s32.totalorder %s31_s22, %s1890_s30  ;;  %p1896_p5 = scmp.lt.s32.totalorder %s1890_s30, %s1890_s30 }
   0xd   :  { %p1897_p6 = por %p1896_p5, %p1895_p4 }
   0xf   :  { %p1898_p7 = pnand %p1897_p6, %p1891_p3 }
  0x11   :  { %1901 = shalt.err (!%p1898_p7)
}
  0x12   :  { %s1999_s7 = smov 448   ;;  %s2000_s8 = smov 28  }
  0x13   :  { %36 = dma.hbm_to_vmem [thread:$0]  %s2144_s1, 7168, %s31_s22, [#allocation6], %s1999_s7, %s1999_s7, %s2000_s8  }
  0x14   :  { %s2001_s11 = smov [#allocation2]   ;;  %s2002_s13 = smov [#allocation7]  }
  0x15   :  { %s21_s12 = sshll.u32 %s2001_s11, 4  ;;  %s44_s14 = sshll.u32 %s2002_s13, 4  ;;  %s22_s12 = int_to_ptr.vmem [resolvable:$true] %s21_s12  ;;  %s45_s14 = int_to_ptr.vmem [resolvable:$true] %s44_s14 }
  0x16   :  { %s1902_s17 = scalar_lea.hbm %s2143_s0, 128 }
  0x17   :  { %p1903_p8 = scmp.ne.s32.totalorder %s2143_s0, %s1902_s17  ;;  %p1906_p9 = scmp.lt.u32.totalorder %s1902_s17, %s2143_s0 }
  0x19   :  { %p1908_p10 = pnand %p1906_p9, %p1903_p8 }
  0x1b   :  { %1911 = shalt.err (!%p1908_p10)
}
  0x1c   :  { %s1912_s1 = scalar_lea.vmem %s22_s12, 128  ;;  %p1917_p12 = scmp.lt.s32.totalorder %s22_s12, %s22_s12 }
  0x1d   :  { %p1913_p11 = scmp.ne.s32.totalorder %s22_s12, %s1912_s1  ;;  %p1918_p13 = scmp.lt.s32.totalorder %s1912_s1, %s1912_s1 }
  0x1f   :  { %p1919_p0 = por %p1918_p13, %p1917_p12 }
  0x21   :  { %p1920_p1 = pnand %p1919_p0, %p1913_p11 }
  0x23   :  { %1923 = shalt.err (!%p1920_p1)
}
  0x24   :  { %24 = dma.hbm_to_vmem [thread:$0]  %s2143_s0, 128, %s22_s12, [#allocation3]  }
  0x25   :  { %s1924_s26 = scalar_lea.hbm %s2146_s3, 7168 }
  0x26   :  { %p1925_p2 = scmp.ne.s32.totalorder %s2146_s3, %s1924_s26  ;;  %p1928_p3 = scmp.lt.u32.totalorder %s1924_s26, %s2146_s3 }
  0x28   :  { %p1930_p4 = pnand %p1928_p3, %p1925_p2 }
  0x2a   :  { %1933 = shalt.err (!%p1930_p4)
}
  0x2b   :  { %s1934_s7 = scalar_lea.vmem %s45_s14, 7168  ;;  %p1939_p6 = scmp.lt.s32.totalorder %s45_s14, %s45_s14 }
  0x2c   :  { %p1935_p5 = scmp.ne.s32.totalorder %s45_s14, %s1934_s7  ;;  %p1940_p7 = scmp.lt.s32.totalorder %s1934_s7, %s1934_s7 }
  0x2e   :  { %p1941_p8 = por %p1940_p7, %p1939_p6 }
  0x30   :  { %p1942_p9 = pnand %p1941_p8, %p1935_p5 }
  0x32   :  { %1945 = shalt.err (!%p1942_p9)
}
  0x33   :  { %s2003_s0 = smov 64   ;;  %s2004_s8 = smov 4  }
  0x34   :  { %50 = dma.hbm_to_vmem [thread:$0]  %s2146_s3, 7168, %s45_s14, [#allocation6], %s2003_s0, %s2003_s0, %s2004_s8  }
  0x35   :  { %s2005_s11 = smov [#allocation8]   ;;  %s1946_s16 = scalar_lea.hbm %s2148_s5, 2048 }
  0x36   :  { %s58_s12 = sshll.u32 %s2005_s11, 4  ;;  %p1947_p10 = scmp.ne.s32.totalorder %s2148_s5, %s1946_s16  ;;  %s59_s12 = int_to_ptr.vmem [resolvable:$true] %s58_s12 }
  0x37   :  { %p1950_p11 = scmp.lt.u32.totalorder %s1946_s16, %s2148_s5 }
  0x39   :  { %p1952_p12 = pnand %p1950_p11, %p1947_p10 }
  0x3b   :  { %1955 = shalt.err (!%p1952_p12)
}
  0x3c   :  { %s1956_s21 = scalar_lea.vmem %s59_s12, 2048  ;;  %p1961_p0 = scmp.lt.s32.totalorder %s59_s12, %s59_s12 }
  0x3d   :  { %p1957_p13 = scmp.ne.s32.totalorder %s59_s12, %s1956_s21  ;;  %p1962_p1 = scmp.lt.s32.totalorder %s1956_s21, %s1956_s21 }
  0x3f   :  { %p1963_p2 = por %p1962_p1, %p1961_p0 }
  0x41   :  { %p1964_p3 = pnand %p1963_p2, %p1957_p13 }
  0x43   :  { %1967 = shalt.err (!%p1964_p3)
}
  0x44   :  { %s2006_s3 = smov 128   ;;  %s2007_s14 = smov 8  }
  0x45   :  { %64 = dma.hbm_to_vmem [thread:$0]  %s2148_s5, 2048, %s59_s12, [#allocation9], %s2006_s3, %s2006_s3, %s2007_s14  }
  0x46   :  { %1990 = dma.done.wait [#allocation3], 128  }
  0x47   :  { %1991 = vsyncadd [#allocation3], 4294967168 }
  0x48   :  { %1992 = dma.done.wait [#allocation6], 14336  }
  0x49   :  { %1993 = vsyncadd [#allocation6], 4294952960 }
  0x4a   :  { %1994 = dma.done.wait [#allocation9], 2048  }
  0x4b   :  { %1995 = vsyncadd [#allocation9], 4294965248  ;;  %v2008_v0 = vmov 0   ;;  %v1692_v1 = vld [vmem:[#allocation5 + $0x4] ss:$28 sps:$4 sm:$0xff]   ;;  %v78_v32 = vld [vmem:[#allocation2] sm:$0xff] }
  0x4c   :  { %501 = vmatprep.mubr.bf16.mxu0 %v2008_v0  ;;  %542 = vmatprep.mubr.bf16.mxu1 %v2008_v0  ;;  %v1694_v2 = vld [vmem:[#allocation5] ss:$28 sps:$4 sm:$0xff]   ;;  %v1695_v3 = vld [vmem:[#allocation5 + $0xc] ss:$28 sps:$4 sm:$0xff]   ;;  %v1700_v6 = vld [vmem:[#allocation5 + $0x38] ss:$28 sps:$4 sm:$0xff]   ;;  %v2097_v35 = vpack.c.bf16 %v78_v32, %v78_v32 }
  0x4d   :  { %469 = vmatprep.subr.bf16.mxu0 %v1692_v1  ;;  %v1697_v4 = vld [vmem:[#allocation5 + $0x8] ss:$28 sps:$4 sm:$0xff]   ;;  %v1698_v5 = vld [vmem:[#allocation5 + $0x3c] ss:$28 sps:$4 sm:$0xff]   ;;  %510 = vmatprep.subr.bf16.mxu1 %v1695_v3  ;;  %v1704_v9 = vld [vmem:[#allocation5 + $0x74] ss:$28 sps:$4 sm:$0xff]  }
  0x4e   :  { %470 = vmatpush1.bf16.msra.mxu0 %v1694_v2  ;;  %v1701_v7 = vld [vmem:[#allocation5 + $0x44] ss:$28 sps:$4 sm:$0xff]   ;;  %511 = vmatpush1.bf16.msra.mxu1 %v1697_v4  ;;  %v1706_v10 = vld [vmem:[#allocation5 + $0x70] ss:$28 sps:$4 sm:$0xff]   ;;  %v1707_v11 = vld [vmem:[#allocation5 + $0x7c] ss:$28 sps:$4 sm:$0xff]  }
  0x4f   :  { %471 = vmatprep.subr.bf16.mxu0 %v1698_v5  ;;  %v1703_v8 = vld [vmem:[#allocation5 + $0x40] ss:$28 sps:$4 sm:$0xff]   ;;  %512 = vmatprep.subr.bf16.mxu1 %v1701_v7  ;;  %v1710_v12 = vld [vmem:[#allocation5 + $0xac] ss:$28 sps:$4 sm:$0xff]   ;;  %v1709_v13 = vld [vmem:[#allocation5 + $0x78] ss:$28 sps:$4 sm:$0xff]  }
  0x50   :  { %v1713_v14 = vld [vmem:[#allocation5 + $0xb4] ss:$28 sps:$4 sm:$0xff]   ;;  %v1712_v15 = vld [vmem:[#allocation5 + $0xa8] ss:$28 sps:$4 sm:$0xff]   ;;  %v1718_v19 = vld [vmem:[#allocation5 + $0xe0] ss:$28 sps:$4 sm:$0xff]  }
  0x51   :  { %v1716_v16 = vld [vmem:[#allocation5 + $0xe4] ss:$28 sps:$4 sm:$0xff]   ;;  %v1715_v17 = vld [vmem:[#allocation5 + $0xb0] ss:$28 sps:$4 sm:$0xff]   ;;  %v1722_v20 = vld [vmem:[#allocation5 + $0x11c] ss:$28 sps:$4 sm:$0xff]  }
  0x52   :  { %472 = vmatpush1.bf16.msra.mxu0 %v1700_v6  ;;  %513 = vmatpush1.bf16.msra.mxu1 %v1703_v8  ;;  %v1719_v18 = vld [vmem:[#allocation5 + $0xec] ss:$28 sps:$4 sm:$0xff]   ;;  %v1725_v22 = vld [vmem:[#allocation5 + $0x124] ss:$28 sps:$4 sm:$0xff]   ;;  %v1724_v23 = vld [vmem:[#allocation5 + $0x118] ss:$28 sps:$4 sm:$0xff]  }
  0x53   :  { %473 = vmatprep.subr.bf16.mxu0 %v1704_v9  ;;  %514 = vmatprep.subr.bf16.mxu1 %v1707_v11  ;;  %v1721_v21 = vld [vmem:[#allocation5 + $0xe8] ss:$28 sps:$4 sm:$0xff]   ;;  %v1728_v24 = vld [vmem:[#allocation5 + $0x154] ss:$28 sps:$4 sm:$0xff]   ;;  %v1727_v25 = vld [vmem:[#allocation5 + $0x120] ss:$28 sps:$4 sm:$0xff]  }
  0x54   :  { %v1731_v26 = vld [vmem:[#allocation5 + $0x15c] ss:$28 sps:$4 sm:$0xff]   ;;  %v1730_v27 = vld [vmem:[#allocation5 + $0x150] ss:$28 sps:$4 sm:$0xff]   ;;  %v1736_v30 = vld [vmem:[#allocation5 + $0x188] ss:$28 sps:$4 sm:$0xff]  }
  0x55   :  { %v1734_v28 = vld [vmem:[#allocation5 + $0x18c] ss:$28 sps:$4 sm:$0xff]   ;;  %v1733_v29 = vld [vmem:[#allocation5 + $0x158] ss:$28 sps:$4 sm:$0xff]   ;;  %v2009_v39 = vmov 0.0   ;;  %vm2010_vm0 = vmmov 0  }
  0x56   :  { %474 = vmatpush1.bf16.msra.mxu0 %v1706_v10  ;;  %515 = vmatpush1.bf16.msra.mxu1 %v1709_v13  ;;  %v1737_v31 = vld [vmem:[#allocation5 + $0x194] ss:$28 sps:$4 sm:$0xff]   ;;  %v1745_v37 = vld [vmem:[#allocation5 + $0x4c] ss:$28 sps:$4 sm:$0xff]   ;;  %v1749_v41 = vld [vmem:[#allocation5 + $0x84] ss:$28 sps:$4 sm:$0xff]  }
  0x57   :  { %475 = vmatprep.subr.bf16.mxu0 %v1710_v12  ;;  %516 = vmatprep.subr.bf16.mxu1 %v1713_v14  ;;  %v1742_v33 = vld [vmem:[#allocation5 + $0x14] ss:$28 sps:$4 sm:$0xff]   ;;  %v1743_v40 = vld [vmem:[#allocation5 + $0x48] ss:$28 sps:$4 sm:$0xff]   ;;  %v1747_v43 = vld [vmem:[#allocation5 + $0x80] ss:$28 sps:$4 sm:$0xff]  }
  0x58   :  { %v1739_v34 = vld [vmem:[#allocation5 + $0x190] ss:$28 sps:$4 sm:$0xff]   ;;  %v1746_v38 = vld [vmem:[#allocation5 + $0x18] ss:$28 sps:$4 sm:$0xff]   ;;  %v1754_v45 = vld [vmem:[#allocation5 + $0x88] ss:$28 sps:$4 sm:$0xff]  }
  0x59   :  { %v1740_v36 = vld [vmem:[#allocation5 + $0x10] ss:$28 sps:$4 sm:$0xff]   ;;  %v1753_v44 = vld [vmem:[#allocation5 + $0xbc] ss:$28 sps:$4 sm:$0xff]   ;;  %v1759_v52 = vld [vmem:[#allocation5 + $0x128] ss:$28 sps:$4 sm:$0xff]  }
  0x5a   :  { %476 = vmatpush1.bf16.msra.mxu0 %v1712_v15  ;;  %517 = vmatpush1.bf16.msra.mxu1 %v1715_v17  ;;  %v1750_v42 = vld [vmem:[#allocation5 + $0x50] ss:$28 sps:$4 sm:$0xff]   ;;  %v1751_v46 = vld [vmem:[#allocation5 + $0xb8] ss:$28 sps:$4 sm:$0xff]   ;;  %v1758_v48 = vld [vmem:[#allocation5 + $0xc0] ss:$28 sps:$4 sm:$0xff]  }
  0x5b   :  { %477 = vmatprep.subr.bf16.mxu0 %v1716_v16  ;;  %518 = vmatprep.subr.bf16.mxu1 %v1719_v18  ;;  %v1757_v47 = vld [vmem:[#allocation5 + $0xf4] ss:$28 sps:$4 sm:$0xff]   ;;  %v1761_v50 = vld [vmem:[#allocation5 + $0x12c] ss:$28 sps:$4 sm:$0xff]   ;;  %v1765_v53 = vld [vmem:[#allocation5 + $0x164] ss:$28 sps:$4 sm:$0xff]  }
  0x5c   :  { %v1755_v49 = vld [vmem:[#allocation5 + $0xf0] ss:$28 sps:$4 sm:$0xff]   ;;  %v1762_v51 = vld [vmem:[#allocation5 + $0xf8] ss:$28 sps:$4 sm:$0xff]   ;;  %v1763_v55 = vld [vmem:[#allocation5 + $0x160] ss:$28 sps:$4 sm:$0xff]  }
  0x5d   :  { %v1766_v54 = vld [vmem:[#allocation5 + $0x130] ss:$28 sps:$4 sm:$0xff]   ;;  %v1769_v56 = vld [vmem:[#allocation5 + $0x19c] ss:$28 sps:$4 sm:$0xff]   ;;  %v1770_v57 = vld [vmem:[#allocation5 + $0x168] ss:$28 sps:$4 sm:$0xff]  }
  0x5e   :  { %478 = vmatpush1.bf16.msra.mxu0 %v1718_v19  ;;  %519 = vmatpush1.bf16.msra.mxu1 %v1721_v21  ;;  %v1767_v58 = vld [vmem:[#allocation5 + $0x198] ss:$28 sps:$4 sm:$0xff]   ;;  %v1772_v59 = vld [vmem:[#allocation7 + $0x40] sm:$0xff]   ;;  %v1776_v1 = vld [vmem:[#allocation7 + $0x48] sm:$0xff]  }
  0x5f   :  { %479 = vmatprep.subr.bf16.mxu0 %v1722_v20  ;;  %520 = vmatprep.subr.bf16.mxu1 %v1725_v22  ;;  %v1771_v60 = vld [vmem:[#allocation5 + $0x1a0] ss:$28 sps:$4 sm:$0xff]   ;;  %v1777_v2 = vld [vmem:[#allocation7 + $0x8] sm:$0xff]   ;;  %v1780_v5 = vld [vmem:[#allocation7 + $0x50] sm:$0xff]  }
  0x60   :  { %v1774_v61 = vld [vmem:[#allocation7 + $0xc0] sm:$0xff]   ;;  %v1778_v3 = vld [vmem:[#allocation7 + $0xc8] sm:$0xff]   ;;  %v1781_v6 = vld [vmem:[#allocation7 + $0x10] sm:$0xff]  }
  0x61   :  { %v1773_v62 = vld [vmem:[#allocation7] sm:$0xff]   ;;  %v1779_v4 = vld [vmem:[#allocation7 + $0x88] sm:$0xff]   ;;  %v1782_v7 = vld [vmem:[#allocation7 + $0xd0] sm:$0xff]  }
  0x62   :  { %480 = vmatpush1.bf16.msra.mxu0 %v1724_v23  ;;  %521 = vmatpush1.bf16.msra.mxu1 %v1727_v25  ;;  %v1775_v63 = vld [vmem:[#allocation7 + $0x80] sm:$0xff]   ;;  %v1783_v8 = vld [vmem:[#allocation7 + $0x90] sm:$0xff]   ;;  %v1784_v9 = vld [vmem:[#allocation7 + $0x58] sm:$0xff]  }
  0x63   :  { %481 = vmatprep.subr.bf16.mxu0 %v1728_v24  ;;  %522 = vmatprep.subr.bf16.mxu1 %v1731_v26  ;;  %v1785_v10 = vld [vmem:[#allocation7 + $0x18] sm:$0xff]   ;;  %v1788_v13 = vld [vmem:[#allocation7 + $0x60] sm:$0xff]   ;;  %v1792_v17 = vld [vmem:[#allocation7 + $0x68] sm:$0xff]  }
  0x64   :  { %v1786_v11 = vld [vmem:[#allocation7 + $0xd8] sm:$0xff]   ;;  %v1789_v14 = vld [vmem:[#allocation7 + $0x20] sm:$0xff]   ;;  %v1793_v18 = vld [vmem:[#allocation7 + $0x28] sm:$0xff]  }
  0x65   :  { %v1787_v12 = vld [vmem:[#allocation7 + $0x98] sm:$0xff]   ;;  %v1790_v15 = vld [vmem:[#allocation7 + $0xe0] sm:$0xff]   ;;  %v1794_v19 = vld [vmem:[#allocation7 + $0xe8] sm:$0xff]  }
  0x66   :  { %482 = vmatpush1.bf16.msra.mxu0 %v1730_v27  ;;  %523 = vmatpush1.bf16.msra.mxu1 %v1733_v29  ;;  %v1791_v16 = vld [vmem:[#allocation7 + $0xa0] sm:$0xff]   ;;  %v1795_v20 = vld [vmem:[#allocation7 + $0xa8] sm:$0xff]   ;;  %v1796_v21 = vld [vmem:[#allocation7 + $0x70] sm:$0xff]  }
  0x67   :  { %483 = vmatprep.subr.bf16.mxu0 %v1734_v28  ;;  %524 = vmatprep.subr.bf16.mxu1 %v1737_v31  ;;  %v1797_v22 = vld [vmem:[#allocation7 + $0x30] sm:$0xff]   ;;  %v1800_v25 = vld [vmem:[#allocation7 + $0x78] sm:$0xff]   ;;  %v1804_v29 = vld [vmem:[#allocation7 + $0x140] sm:$0xff]  }
  0x68   :  { %v1798_v23 = vld [vmem:[#allocation7 + $0xf0] sm:$0xff]   ;;  %v1801_v26 = vld [vmem:[#allocation7 + $0x38] sm:$0xff]  }
  0x69   :  { %v1799_v24 = vld [vmem:[#allocation7 + $0xb0] sm:$0xff]   ;;  %v1802_v27 = vld [vmem:[#allocation7 + $0xf8] sm:$0xff]  }
  0x6a   :  { %484 = vmatpush1.bf16.msra.mxu0 %v1736_v30  ;;  %525 = vmatpush1.bf16.msra.mxu1 %v1739_v34  ;;  %v1803_v28 = vld [vmem:[#allocation7 + $0xb8] sm:$0xff]   ;;  %v146_v30 = vlaneseq }
  0x6b   :  { %551 = vmatprep.subr.bf16.mxu0 %v1742_v33  ;;  %1638 = vmatprep.subr.bf16.mxu1 %v2009_v39  ;;  %v144_v33 = vld [vmem:[%s2145_s2] sm:$0xff] }
  0x6c   :  { %v147_v31 = vshrl.u32 %v146_v30, 7  ;;  %v1816_v30 = vld [vmem:[#allocation7 + $0x160] sm:$0xff]  }
  0x6d   :  { %502 = vmatmul.mubr.bf16.vlgmr.msra.gmra.mrb[0].mxu0 %v2097_v35  ;;  %543 = vmatmul.mubr.bf16.vlgmr.msra.gmra.mrb[0].mxu1 %v2097_v35 }
  0x6e   :  { %552 = vmatpush1.bf16.msra.mxu0 %v1740_v36  ;;  %583 = vmatprep.mubr.bf16.mxu0 %v2008_v0  ;;  %v148_v32 = vsub.s32 0, %v147_v31  ;;  %v152_v34 = vsub.s32 1, %v147_v31  ;;  %v160_v36 = vsub.s32 3, %v147_v31 }
  0x6f   :  { %553 = vmatprep.subr.bf16.mxu0 %v1745_v37  ;;  %1639 = vmatpush3.bf16.msra.mxu1 %v1746_v38 }
  0x70   :  { %1654 = vmatprep.mubr.msk.bf16.mxu1 %vm2010_vm0, %v2009_v39  ;;  %1640 = vmatprep.subr.bf16.mxu1 %v2009_v39  ;;  %v149_v37 = vrot.slane %v144_v33, %v148_v32  ;;  %v153_v38 = vrot.slane %v144_v33, %v152_v34  ;;  %v1817_v32 = vld [vmem:[#allocation7 + $0x120] sm:$0xff]  }
  0x71   :  { %v1818_v34 = vld [vmem:[#allocation7 + $0x1a0] sm:$0xff]  }
  0x72   :  { %554 = vmatpush1.bf16.msra.mxu0 %v1743_v40 }
  0x73   :  { %555 = vmatprep.subr.bf16.mxu0 %v1749_v41  ;;  %1641 = vmatpush3.bf16.msra.mxu1 %v1750_v42  ;;  %v161_v42 = vrot.slane %v144_v33, %v160_v36 }
  0x74   :  { %1642 = vmatprep.subr.bf16.mxu1 %v2009_v39 }
  0x76   :  { %556 = vmatpush1.bf16.msra.mxu0 %v1747_v43 }
  0x77   :  { %557 = vmatprep.subr.bf16.mxu0 %v1753_v44  ;;  %1643 = vmatpush3.bf16.msra.mxu1 %v1754_v45 }
  0x78   :  { %1644 = vmatprep.subr.bf16.mxu1 %v2009_v39 }
  0x7a   :  { %558 = vmatpush1.bf16.msra.mxu0 %v1751_v46 }
  0x7b   :  { %559 = vmatprep.subr.bf16.mxu0 %v1757_v47  ;;  %1645 = vmatpush3.bf16.msra.mxu1 %v1758_v48 }
  0x7c   :  { %1646 = vmatprep.subr.bf16.mxu1 %v2009_v39 }
  0x7e   :  { %560 = vmatpush1.bf16.msra.mxu0 %v1755_v49 }
  0x7f   :  { %561 = vmatprep.subr.bf16.mxu0 %v1761_v50  ;;  %1647 = vmatpush3.bf16.msra.mxu1 %v1762_v51 }
  0x80   :  { %1648 = vmatprep.subr.bf16.mxu1 %v2009_v39 }
  0x82   :  { %562 = vmatpush1.bf16.msra.mxu0 %v1759_v52 }
  0x83   :  { %563 = vmatprep.subr.bf16.mxu0 %v1765_v53  ;;  %1649 = vmatpush3.bf16.msra.mxu1 %v1766_v54 }
  0x84   :  { %1650 = vmatprep.subr.bf16.mxu1 %v2009_v39 }
  0x86   :  { %564 = vmatpush1.bf16.msra.mxu0 %v1763_v55 }
  0x87   :  { %565 = vmatprep.subr.bf16.mxu0 %v1769_v56  ;;  %1651 = vmatpush3.bf16.msra.mxu1 %v1770_v57 }
  0x88   :  { %1652 = vmatprep.subr.bf16.mxu1 %v2009_v39 }
  0x8a   :  { %566 = vmatpush1.bf16.msra.mxu0 %v1767_v58 }
  0x8b   :  { %1563 = vmatprep.subr.bf16.mxu0 %v1772_v59  ;;  %1653 = vmatpush3.bf16.msra.mxu1 %v1771_v60 }
  0x8c   :  { %1585 = vmatprep.subr.bf16.mxu1 %v1774_v61  ;;  %v164_v61 = vsub.s32 4, %v147_v31 }
  0x8d   :  { %584 = vmatmul.mubr.bf16.vlgmr.msra.gmra.mrb[4].mxu0 %v2097_v35 }
  0x8e   :  { %1564 = vmatpush3.bf16.msra.mxu0 %v1773_v62  ;;  %1655 = vmatmul.mubr.bf16.vlgmr.msra.gmra.mrb[4].mxu1 %v2097_v35  ;;  %v156_v35 = vsub.s32 2, %v147_v31 }
  0x8f   :  { %1586 = vmatpush3.bf16.msra.mxu1 %v1775_v63  ;;  %1565 = vmatprep.subr.bf16.mxu0 %v1776_v1  ;;  %v1805_v1 = vld [vmem:[#allocation7 + $0x100] sm:$0xff]  }
  0x90   :  { %1587 = vmatprep.subr.bf16.mxu1 %v1778_v3  ;;  %v157_v40 = vrot.slane %v144_v33, %v156_v35 }
  0x92   :  { %1566 = vmatpush3.bf16.msra.mxu0 %v1777_v2  ;;  %v168_v2 = vsub.s32 5, %v147_v31 }
  0x93   :  { %1588 = vmatpush3.bf16.msra.mxu1 %v1779_v4  ;;  %1567 = vmatprep.subr.bf16.mxu0 %v1780_v5  ;;  %v1807_v5 = vld [vmem:[#allocation7 + $0x148] sm:$0xff]  }
  0x94   :  { %1589 = vmatprep.subr.bf16.mxu1 %v1782_v7 }
  0x96   :  { %1568 = vmatpush3.bf16.msra.mxu0 %v1781_v6  ;;  %v172_v6 = vsub.s32 6, %v147_v31  ;;  %v1815_v31 = vld [vmem:[#allocation7 + $0x198] sm:$0xff]  }
  0x97   :  { %1590 = vmatpush3.bf16.msra.mxu1 %v1783_v8  ;;  %1569 = vmatprep.subr.bf16.mxu0 %v1784_v9  ;;  %v1806_v8 = vld [vmem:[#allocation7 + $0x180] sm:$0xff]   ;;  %v165_v9 = vrot.slane %v144_v33, %v164_v61 }
  0x98   :  { %1591 = vmatprep.subr.bf16.mxu1 %v1786_v11  ;;  %v1808_v11 = vld [vmem:[#allocation7 + $0x108] sm:$0xff]  }
  0x99   :  { %v1840_v61 = vld [vmem:[#allocation8 + $0x40] ss:$8 sps:$4 sm:$0xff]  }
  0x9a   :  { %1570 = vmatpush3.bf16.msra.mxu0 %v1785_v10  ;;  %v169_v10 = vrot.slane %v144_v33, %v168_v2  ;;  %v1851_v2 = vld [vmem:[#allocation8 + $0x74] ss:$8 sps:$4 sm:$0xff]  }
  0x9b   :  { %1592 = vmatpush3.bf16.msra.mxu1 %v1787_v12  ;;  %1571 = vmatprep.subr.bf16.mxu0 %v1788_v13  ;;  %v173_v12 = vrot.slane %v144_v33, %v172_v6  ;;  %v1810_v13 = vld [vmem:[#allocation7 + $0x150] sm:$0xff]   ;;  %v1819_v33 = vld [vmem:[#allocation7 + $0x168] sm:$0xff]  }
  0x9c   :  { %1593 = vmatprep.subr.bf16.mxu1 %v1790_v15  ;;  %v1809_v15 = vld [vmem:[#allocation7 + $0x188] sm:$0xff]  }
  0x9e   :  { %1572 = vmatpush3.bf16.msra.mxu0 %v1789_v14 }
  0x9f   :  { %1594 = vmatpush3.bf16.msra.mxu1 %v1791_v16  ;;  %1573 = vmatprep.subr.bf16.mxu0 %v1792_v17 }
  0xa0   :  { %1595 = vmatprep.subr.bf16.mxu1 %v1794_v19 }
  0xa2   :  { %1574 = vmatpush3.bf16.msra.mxu0 %v1793_v18 }
  0xa3   :  { %1596 = vmatpush3.bf16.msra.mxu1 %v1795_v20  ;;  %1575 = vmatprep.subr.bf16.mxu0 %v1796_v21  ;;  %v1811_v21 = vld [vmem:[#allocation7 + $0x110] sm:$0xff]  }
  0xa4   :  { %1597 = vmatprep.subr.bf16.mxu1 %v1798_v23 }
  0xa6   :  { %1576 = vmatpush3.bf16.msra.mxu0 %v1797_v22 }
  0xa7   :  { %1598 = vmatpush3.bf16.msra.mxu1 %v1799_v24  ;;  %1577 = vmatprep.subr.bf16.mxu0 %v1800_v25  ;;  %v1813_v25 = vld [vmem:[#allocation7 + $0x158] sm:$0xff]  }
  0xa8   :  { %1599 = vmatprep.subr.bf16.mxu1 %v1802_v27  ;;  %v1812_v27 = vld [vmem:[#allocation7 + $0x190] sm:$0xff]  }
  0xaa   :  { %1578 = vmatpush3.bf16.msra.mxu0 %v1801_v26 }
  0xab   :  { %1600 = vmatpush3.bf16.msra.mxu1 %v1803_v28  ;;  %1607 = vmatprep.subr.bf16.mxu0 %v1804_v29  ;;  %v1814_v29 = vld [vmem:[#allocation7 + $0x118] sm:$0xff]  }
  0xac   :  { %1658 = vmatprep.subr.bf16.mxu1 %v2009_v39 }
 0x140   :  { %v503_v41 = vpop.f32.mrb[0].mxu0  ;;  %v544_v46 = vpop.f32.mrb[0].mxu1 }
 0x141   :  { %v504_v43 = vadd.f32 %v503_v41, %v149_v37  ;;  %v505_v44 = vpop.f32.mrb[1].mxu0  ;;  %v545_v48 = vadd.f32 %v544_v46, %v157_v40  ;;  %v546_v49 = vpop.f32.mrb[1].mxu1  ;;  %v1820_v37 = vld [vmem:[#allocation7 + $0x128] sm:$0xff]   ;;  %v1822_v40 = vld [vmem:[#allocation7 + $0x170] sm:$0xff]  }
 0x142   :  { %v506_v45 = vadd.f32 %v505_v44, %v153_v38  ;;  %v507_v47 = vpop.f32.mrb[2].mxu0  ;;  %v547_v51 = vadd.f32 %v546_v49, %v161_v42  ;;  %v548_v52 = vpop.f32.mrb[2].mxu1  ;;  %v1821_v41 = vld [vmem:[#allocation7 + $0x1a8] sm:$0xff]   ;;  %v1823_v42 = vld [vmem:[#allocation7 + $0x130] sm:$0xff]  }
 0x143   :  { %1852 = vtanh.f32 %v504_v43  ;;  %v508_v50 = vpop.f32.mrb[3].mxu0  ;;  %v549_v53 = vpop.f32.mrb[3].mxu1  ;;  %v1825_v43 = vld [vmem:[#allocation7 + $0x178] sm:$0xff]   ;;  %v1824_v44 = vld [vmem:[#allocation7 + $0x1b0] sm:$0xff]  }
 0x144   :  { %1854 = vtanh.f32 %v506_v45  ;;  %v1826_v45 = vld [vmem:[#allocation7 + $0x138] sm:$0xff]   ;;  %v1828_v53 = vld [vmem:[#allocation8] ss:$8 sps:$4 sm:$0xff]  }
 0x145   :  { %1856 = vtanh.f32 %v545_v48  ;;  %v1827_v47 = vld [vmem:[#allocation7 + $0x1b8] sm:$0xff]  }
 0x146   :  { %1858 = vtanh.f32 %v547_v51 }
 0x14d   :  { %v1853_v54 = vpop.eup %1852 }
 0x14e   :  { %v1855_v55 = vpop.eup %1854  ;;  %1860 = vtanh.f32 %v1853_v54  ;;  %v1830_v54 = vld [vmem:[#allocation8 + $0x4] ss:$8 sps:$4 sm:$0xff]  }
 0x14f   :  { %v1857_v56 = vpop.eup %1856  ;;  %1862 = vtanh.f32 %v1855_v55  ;;  %v1833_v55 = vld [vmem:[#allocation8 + $0x14] ss:$8 sps:$4 sm:$0xff]  }
 0x150   :  { %v1859_v57 = vpop.eup %1858  ;;  %1864 = vtanh.f32 %v1857_v56  ;;  %v1831_v56 = vld [vmem:[#allocation8 + $0x10] ss:$8 sps:$4 sm:$0xff]  }
 0x151   :  { %1866 = vtanh.f32 %v1859_v57  ;;  %v1836_v57 = vld [vmem:[#allocation8 + $0x24] ss:$8 sps:$4 sm:$0xff]  }
 0x158   :  { %v1861_v58 = vpop.eup %1860 }
 0x159   :  { %v1863_v59 = vpop.eup %1862  ;;  %v646_v60 = vpack.c.bf16 %v1861_v58, %v1861_v58  ;;  %v1839_v58 = vld [vmem:[#allocation8 + $0x34] ss:$8 sps:$4 sm:$0xff]  }
 0x15a   :  { %v1865_v62 = vpop.eup %1864  ;;  %v647_v63 = vpack.c.bf16 %v1863_v59, %v1863_v59  ;;  %v1837_v59 = vld [vmem:[#allocation8 + $0x30] ss:$8 sps:$4 sm:$0xff]  }
 0x15b   :  { %v1867_v3 = vpop.eup %1866  ;;  %v648_v4 = vpack.c.bf16 %v1865_v62, %v1865_v62  ;;  %v1843_v62 = vld [vmem:[#allocation8 + $0x50] ss:$8 sps:$4 sm:$0xff]  }
 0x15c   :  { %1140 = vmatprep.mubr.bf16.mxu0 %v647_v63  ;;  %v649_v7 = vpack.c.bf16 %v1867_v3, %v1867_v3  ;;  %v1848_v63 = vld [vmem:[#allocation8 + $0x64] ss:$8 sps:$4 sm:$0xff]   ;;  %v1849_v3 = vld [vmem:[#allocation8 + $0x70] ss:$8 sps:$4 sm:$0xff]  }
 0x15d   :  { %1141 = vmatmul.mubr.bf16.vlgmr.msra.gmra.mrb[8].mxu0 %v646_v60  ;;  %v1842_v60 = vld [vmem:[#allocation8 + $0x44] ss:$8 sps:$4 sm:$0xff]  }
 0x15e   :  { %1180 = vmatprep.mubr.bf16.mxu1 %v649_v7  ;;  %1608 = vmatpush3.bf16.msra.mxu0 %v1805_v1  ;;  %v1846_v1 = vld [vmem:[#allocation8 + $0x60] ss:$8 sps:$4 sm:$0xff]  }
 0x15f   :  { %1181 = vmatmul.mubr.bf16.vlgmr.msra.gmra.mrb[8].mxu1 %v648_v4  ;;  %1609 = vmatprep.subr.bf16.mxu0 %v1807_v5  ;;  %v1481_v5 = vld [vmem:[%s2147_s4] ss:$0 sm:$0xff]  ;;  %s2011_s4 = smov [#allocation10]  }
 0x160   :  { %v585_v14 = vpop.f32.mrb[4].mxu0  ;;  %1659 = vmatpush3.bf16.msra.mxu1 %v1806_v8  ;;  %1674 = vmatprep.mubr.msk.bf16.mxu1 %vm2010_vm0, %v2009_v39  ;;  %s1414_s25 = sshll.u32 %s2011_s4, 4  ;;  %s1415_s25 = int_to_ptr.vmem [resolvable:$true] %s1414_s25 }
 0x161   :  { %v586_v16 = vadd.f32 %v585_v14, %v165_v9  ;;  %v587_v17 = vpop.f32.mrb[5].mxu0  ;;  %1660 = vmatprep.subr.bf16.mxu1 %v2009_v39  ;;  %v626_v20 = vpop.f32.mrb[4].mxu1  ;;  %s1968_s26 = scalar_lea.vmem %s1415_s25, 256  ;;  %p1973_p5 = scmp.lt.s32.totalorder %s1415_s25, %s1415_s25 }
 0x162   :  { %v588_v18 = vadd.f32 %v587_v17, %v169_v10  ;;  %v589_v19 = vpop.f32.mrb[6].mxu0  ;;  %1610 = vmatpush3.bf16.msra.mxu0 %v1808_v11  ;;  %v627_v23 = vadd.f32 %v626_v20, %v173_v12  ;;  %v1656_v24 = vpop.f32.mrb[5].mxu1  ;;  %p1969_p4 = scmp.ne.s32.totalorder %s1415_s25, %s1968_s26  ;;  %p1974_p6 = scmp.lt.s32.totalorder %s1968_s26, %s1968_s26 }
 0x163   :  { %1868 = vtanh.f32 %v586_v16  ;;  %v590_v22 = vpop.f32.mrb[7].mxu0  ;;  %1611 = vmatprep.subr.bf16.mxu0 %v1810_v13  ;;  %v629_v26 = vpop.f32.mrb[6].mxu1 }
 0x164   :  { %1870 = vtanh.f32 %v588_v18  ;;  %1661 = vmatpush3.bf16.msra.mxu1 %v1809_v15  ;;  %v1657_v28 = vpop.f32.mrb[7].mxu1  ;;  %p1975_p7 = por %p1974_p6, %p1973_p5 }
 0x165   :  { %1872 = vtanh.f32 %v627_v23  ;;  %1662 = vmatprep.subr.bf16.mxu1 %v2009_v39 }
 0x166   :  { %1612 = vmatpush3.bf16.msra.mxu0 %v1811_v21  ;;  %p1976_p8 = pnand %p1975_p7, %p1969_p4 }
 0x167   :  { %1613 = vmatprep.subr.bf16.mxu0 %v1813_v25 }
 0x168   :  { %1663 = vmatpush3.bf16.msra.mxu1 %v1812_v27 }
 0x169   :  { %1664 = vmatprep.subr.bf16.mxu1 %v2009_v39 }
 0x16a   :  { %1614 = vmatpush3.bf16.msra.mxu0 %v1814_v29 }
 0x16b   :  { %1615 = vmatprep.subr.bf16.mxu0 %v1816_v30 }
 0x16c   :  { %1665 = vmatpush3.bf16.msra.mxu1 %v1815_v31 }
 0x16d   :  { %v1869_v35 = vpop.eup %1868  ;;  %1666 = vmatprep.subr.bf16.mxu1 %v2009_v39 }
 0x16e   :  { %v1871_v36 = vpop.eup %1870  ;;  %1874 = vtanh.f32 %v1869_v35  ;;  %1616 = vmatpush3.bf16.msra.mxu0 %v1817_v32 }
 0x16f   :  { %v1873_v38 = vpop.eup %1872  ;;  %1876 = vtanh.f32 %v1871_v36  ;;  %1617 = vmatprep.subr.bf16.mxu0 %v1819_v33 }
 0x170   :  { %1878 = vtanh.f32 %v1873_v38  ;;  %1667 = vmatpush3.bf16.msra.mxu1 %v1818_v34 }
 0x171   :  { %1668 = vmatprep.subr.bf16.mxu1 %v2009_v39 }
 0x172   :  { %1618 = vmatpush3.bf16.msra.mxu0 %v1820_v37 }
 0x173   :  { %1619 = vmatprep.subr.bf16.mxu0 %v1822_v40 }
 0x174   :  { %1669 = vmatpush3.bf16.msra.mxu1 %v1821_v41 }
 0x175   :  { %1670 = vmatprep.subr.bf16.mxu1 %v2009_v39 }
 0x176   :  { %1620 = vmatpush3.bf16.msra.mxu0 %v1823_v42 }
 0x177   :  { %1621 = vmatprep.subr.bf16.mxu0 %v1825_v43 }
 0x178   :  { %v1875_v46 = vpop.eup %1874  ;;  %1671 = vmatpush3.bf16.msra.mxu1 %v1824_v44 }
 0x179   :  { %v1877_v48 = vpop.eup %1876  ;;  %1672 = vmatprep.subr.bf16.mxu1 %v2009_v39  ;;  %v650_v51 = vpack.c.bf16 %v1875_v46, %v1875_v46  ;;  %v1834_v39 = vld [vmem:[#allocation8 + $0x20] ss:$8 sps:$4 sm:$0xff]  }
 0x17a   :  { %v1879_v49 = vpop.eup %1878  ;;  %1622 = vmatpush3.bf16.msra.mxu0 %v1826_v45  ;;  %v651_v50 = vpack.c.bf16 %v1877_v48, %v1877_v48 }
 0x17b   :  { %v652_v52 = vpack.c.bf16 %v1879_v49, %v1879_v49  ;;  %1365 = vmatprep.subr.bf16.mxu0 %v1830_v54 }
 0x17c   :  { %1220 = vmatprep.mubr.bf16.mxu0 %v651_v50  ;;  %1673 = vmatpush3.bf16.msra.mxu1 %v1827_v47 }
 0x17d   :  { %1221 = vmatmul.mubr.bf16.vlgmr.msra.gmra.mrb[12].mxu0 %v650_v51 }
 0x17e   :  { %1397 = vmatprep.mubr.bf16.mxu0 %v2008_v0  ;;  %1366 = vmatpush1.bf16.msra.mxu0 %v1828_v53  ;;  %v1845_v0 = vld [vmem:[#allocation8 + $0x54] ss:$8 sps:$4 sm:$0xff]  }
 0x17f   :  { %1675 = vmatmul.mubr.bf16.vlgmr.msra.gmra.mrb[12].mxu1 %v652_v52  ;;  %1367 = vmatprep.subr.bf16.mxu0 %v1833_v55 }
 0x182   :  { %1368 = vmatpush1.bf16.msra.mxu0 %v1831_v56 }
 0x183   :  { %1369 = vmatprep.subr.bf16.mxu0 %v1836_v57 }
 0x186   :  { %1370 = vmatpush1.bf16.msra.mxu0 %v1834_v39 }
 0x187   :  { %1371 = vmatprep.subr.bf16.mxu0 %v1839_v58 }
 0x18a   :  { %1372 = vmatpush1.bf16.msra.mxu0 %v1837_v59 }
 0x18b   :  { %1373 = vmatprep.subr.bf16.mxu0 %v1842_v60 }
 0x18e   :  { %1374 = vmatpush1.bf16.msra.mxu0 %v1840_v61 }
 0x18f   :  { %1375 = vmatprep.subr.bf16.mxu0 %v1845_v0 }
 0x192   :  { %1376 = vmatpush1.bf16.msra.mxu0 %v1843_v62 }
 0x193   :  { %1377 = vmatprep.subr.bf16.mxu0 %v1848_v63 }
 0x196   :  { %1378 = vmatpush1.bf16.msra.mxu0 %v1846_v1 }
 0x197   :  { %1379 = vmatprep.subr.bf16.mxu0 %v1851_v2 }
 0x19a   :  { %1380 = vmatpush1.bf16.msra.mxu0 %v1849_v3 }
 0x230   :  { %v1579_v4 = vpop.f32.mrb[8].mxu0 }
 0x231   :  { %v1580_v6 = vpop.f32.mrb[9].mxu0 }
 0x232   :  { %v1581_v7 = vadd.f32 %v1580_v6, %v1579_v4  ;;  %v1601_v8 = vpop.f32.mrb[8].mxu1  ;;  %v1582_v9 = vpop.f32.mrb[10].mxu0 }
 0x233   :  { %v1602_v10 = vpop.f32.mrb[9].mxu1  ;;  %v1583_v11 = vpop.f32.mrb[11].mxu0 }
 0x234   :  { %v1143_v12 = vadd.f32 %v1581_v7, %v1481_v5  ;;  %v1603_v13 = vadd.f32 %v1602_v10, %v1601_v8  ;;  %v1604_v14 = vpop.f32.mrb[10].mxu1 }
 0x235   :  { %v1605_v15 = vpop.f32.mrb[11].mxu1 }
 0x236   :  { %v1183_v16 = vadd.f32 %v1603_v13, %v1143_v12 }
 0x250   :  { %v1623_v17 = vpop.f32.mrb[12].mxu0 }
 0x251   :  { %v1624_v18 = vpop.f32.mrb[13].mxu0 }
 0x252   :  { %v1625_v19 = vadd.f32 %v1624_v18, %v1623_v17  ;;  %v1626_v20 = vpop.f32.mrb[14].mxu0  ;;  %v1262_v21 = vpop.f32.mrb[12].mxu1 }
 0x253   :  { %v1627_v22 = vpop.f32.mrb[15].mxu0  ;;  %v1676_v23 = vpop.f32.mrb[13].mxu1 }
 0x254   :  { %v1223_v24 = vadd.f32 %v1625_v19, %v1183_v16  ;;  %v1265_v25 = vpop.f32.mrb[14].mxu1 }
 0x255   :  { %v1677_v26 = vpop.f32.mrb[15].mxu1 }
 0x256   :  { %v1263_v27 = vadd.f32 %v1262_v21, %v1223_v24 }
 0x258   :  { %v1268_v28 = vpack.c.bf16 %v1263_v27, %v1263_v27 }
 0x25a   :  { %1398 = vmatmul.mubr.bf16.vlgmr.msra.gmra.mrb[16].mxu0 %v1268_v28 }
 0x32d   :  { %v1399_v29 = vpop.f32.mrb[16].mxu0 }
 0x32e   :  { %1406 = vst [vmem:[#allocation10] sm:$0xff] %v1399_v29  ;;  %v1401_v30 = vpop.f32.mrb[17].mxu0 }
 0x32f   :  { %1407 = vst [vmem:[#allocation10 + $0x8] sm:$0xff] %v1401_v30  ;;  %v1403_v31 = vpop.f32.mrb[18].mxu0 }
 0x330   :  { %v1404_v32 = vpop.f32.mrb[19].mxu0 }
 0x331   :  { %1979 = shalt.err (!%p1976_p8)
}
 0x332   :  { %s1980_s29 = scalar_lea.hbm %s2149_s6, 256 }
 0x333   :  { %p1981_p9 = scmp.ne.s32.totalorder %s2149_s6, %s1980_s29  ;;  %p1984_p10 = scmp.lt.u32.totalorder %s1980_s29, %s2149_s6 }
 0x335   :  { %p1986_p11 = pnand %p1984_p10, %p1981_p9 }
 0x337   :  { %1989 = shalt.err (!%p1986_p11)
}
 0x338   :  { %1417 = dma.vmem_to_hbm [thread:$0]  %s1415_s25, 256, %s2149_s6, [#allocation4]  }
 0x339   :  { %1996 = dma.done.wait [#allocation4], 256  }
 0x33a   :  { %1997 = vsyncadd [#allocation4], 4294967040 }
 0x33b   :  { %1421 = vsyncpa [#allocation3], 1 }
 0x33c   :  { %1422 = vsyncpa [#allocation6], 1 }
 0x33d   :  { %1423 = vsyncpa [#allocation9], 1 }
 0x33e   :  { %1424 = vsyncpa [#allocation4], 1 }

// kernel: tpu_custom_call.1
= control target key start
LH: loop header
LB: loop body
LE: loop exit
PB: predicated region body
PF: predicated region fallthrough
CT: control target
= control target key end

     0   :  { %11 = vsyncpa [#allocation3], 0  ;;  %s2143_s0 = inlined_call_operand.hbm [shape: f32[8,128], index: 0, kind: input, shape index: {}]   ;;  %s2144_s1 = inlined_call_operand.hbm [shape: bf16[128,896], index: 1, kind: input, shape index: {}]   ;;  %s2145_s2 = inlined_call_operand.vmem [shape: f32[1,896], index: 2, kind: input, shape index: {}]   ;;  %s2146_s3 = inlined_call_operand.hbm [shape: bf16[896,128], index: 3, kind: input, shape index: {}]   ;;  %s2147_s4 = inlined_call_operand.vmem [shape: f32[1,128], index: 4, kind: input, shape index: {}]   ;;  %s2148_s5 = inlined_call_operand.hbm [shape: bf16[128,256], index: 5, kind: input, shape index: {}]   ;;  %s2149_s6 = inlined_call_operand.hbm [shape: f32[8,256], index: 6, kind: output, shape index: {}]  }
   0x1   :  { %12 = vsyncpa [#allocation6], 0 }
   0x2   :  { %13 = vsyncpa [#allocation9], 0 }
   0x3   :  { %14 = vsyncpa [#allocation4], 0  ;;  %s1998_s21 = smov [#allocation5]   ;;  %s1880_s25 = scalar_lea.hbm %s2144_s1, 7168 }
   0x4   :  { %s30_s22 = sshll.u32 %s1998_s21, 4  ;;  %p1881_p0 = scmp.ne.s32.totalorder %s2144_s1, %s1880_s25  ;;  %s31_s22 = int_to_ptr.vmem [resolvable:$true] %s30_s22 }
   0x5   :  { %p1884_p1 = scmp.lt.u32.totalorder %s1880_s25, %s2144_s1 }
   0x7   :  { %p1886_p2 = pnand %p1884_p1, %p1881_p0 }
   0x9   :  { %1889 = shalt.err (!%p1886_p2)
}
   0xa   :  { %s1890_s30 = scalar_lea.vmem %s31_s22, 7168  ;;  %p1895_p4 = scmp.lt.s32.totalorder %s31_s22, %s31_s22 }
   0xb   :  { %p1891_p3 = scmp.ne.s32.totalorder %s31_s22, %s1890_s30  ;;  %p1896_p5 = scmp.lt.s32.totalorder %s1890_s30, %s1890_s30 }
   0xd   :  { %p1897_p6 = por %p1896_p5, %p1895_p4 }
   0xf   :  { %p1898_p7 = pnand %p1897_p6, %p1891_p3 }
  0x11   :  { %1901 = shalt.err (!%p1898_p7)
}
  0x12   :  { %s1999_s7 = smov 448   ;;  %s2000_s8 = smov 28  }
  0x13   :  { %36 = dma.hbm_to_vmem [thread:$0]  %s2144_s1, 7168, %s31_s22, [#allocation6], %s1999_s7, %s1999_s7, %s2000_s8  }
  0x14   :  { %s2001_s11 = smov [#allocation2]   ;;  %s2002_s13 = smov [#allocation7]  }
  0x15   :  { %s21_s12 = sshll.u32 %s2001_s11, 4  ;;  %s44_s14 = sshll.u32 %s2002_s13, 4  ;;  %s22_s12 = int_to_ptr.vmem [resolvable:$true] %s21_s12  ;;  %s45_s14 = int_to_ptr.vmem [resolvable:$true] %s44_s14 }
  0x16   :  { %s1902_s17 = scalar_lea.hbm %s2143_s0, 128 }
  0x17   :  { %p1903_p8 = scmp.ne.s32.totalorder %s2143_s0, %s1902_s17  ;;  %p1906_p9 = scmp.lt.u32.totalorder %s1902_s17, %s2143_s0 }
  0x19   :  { %p1908_p10 = pnand %p1906_p9, %p1903_p8 }
  0x1b   :  { %1911 = shalt.err (!%p1908_p10)
}
  0x1c   :  { %s1912_s1 = scalar_lea.vmem %s22_s12, 128  ;;  %p1917_p12 = scmp.lt.s32.totalorder %s22_s12, %s22_s12 }
  0x1d   :  { %p1913_p11 = scmp.ne.s32.totalorder %s22_s12, %s1912_s1  ;;  %p1918_p13 = scmp.lt.s32.totalorder %s1912_s1, %s1912_s1 }
  0x1f   :  { %p1919_p0 = por %p1918_p13, %p1917_p12 }
  0x21   :  { %p1920_p1 = pnand %p1919_p0, %p1913_p11 }
  0x23   :  { %1923 = shalt.err (!%p1920_p1)
}
  0x24   :  { %24 = dma.hbm_to_vmem [thread:$0]  %s2143_s0, 128, %s22_s12, [#allocation3]  }
  0x25   :  { %s1924_s26 = scalar_lea.hbm %s2146_s3, 7168 }
  0x26   :  { %p1925_p2 = scmp.ne.s32.totalorder %s2146_s3, %s1924_s26  ;;  %p1928_p3 = scmp.lt.u32.totalorder %s1924_s26, %s2146_s3 }
  0x28   :  { %p1930_p4 = pnand %p1928_p3, %p1925_p2 }
  0x2a   :  { %1933 = shalt.err (!%p1930_p4)
}
  0x2b   :  { %s1934_s7 = scalar_lea.vmem %s45_s14, 7168  ;;  %p1939_p6 = scmp.lt.s32.totalorder %s45_s14, %s45_s14 }
  0x2c   :  { %p1935_p5 = scmp.ne.s32.totalorder %s45_s14, %s1934_s7  ;;  %p1940_p7 = scmp.lt.s32.totalorder %s1934_s7, %s1934_s7 }
  0x2e   :  { %p1941_p8 = por %p1940_p7, %p1939_p6 }
  0x30   :  { %p1942_p9 = pnand %p1941_p8, %p1935_p5 }
  0x32   :  { %1945 = shalt.err (!%p1942_p9)
}
  0x33   :  { %s2003_s0 = smov 64   ;;  %s2004_s8 = smov 4  }
  0x34   :  { %50 = dma.hbm_to_vmem [thread:$0]  %s2146_s3, 7168, %s45_s14, [#allocation6], %s2003_s0, %s2003_s0, %s2004_s8  }
  0x35   :  { %s2005_s11 = smov [#allocation8]   ;;  %s1946_s16 = scalar_lea.hbm %s2148_s5, 2048 }
  0x36   :  { %s58_s12 = sshll.u32 %s2005_s11, 4  ;;  %p1947_p10 = scmp.ne.s32.totalorder %s2148_s5, %s1946_s16  ;;  %s59_s12 = int_to_ptr.vmem [resolvable:$true] %s58_s12 }
  0x37   :  { %p1950_p11 = scmp.lt.u32.totalorder %s1946_s16, %s2148_s5 }
  0x39   :  { %p1952_p12 = pnand %p1950_p11, %p1947_p10 }
  0x3b   :  { %1955 = shalt.err (!%p1952_p12)
}
  0x3c   :  { %s1956_s21 = scalar_lea.vmem %s59_s12, 2048  ;;  %p1961_p0 = scmp.lt.s32.totalorder %s59_s12, %s59_s12 }
  0x3d   :  { %p1957_p13 = scmp.ne.s32.totalorder %s59_s12, %s1956_s21  ;;  %p1962_p1 = scmp.lt.s32.totalorder %s1956_s21, %s1956_s21 }
  0x3f   :  { %p1963_p2 = por %p1962_p1, %p1961_p0 }
  0x41   :  { %p1964_p3 = pnand %p1963_p2, %p1957_p13 }
  0x43   :  { %1967 = shalt.err (!%p1964_p3)
}
  0x44   :  { %s2006_s3 = smov 128   ;;  %s2007_s14 = smov 8  }
  0x45   :  { %64 = dma.hbm_to_vmem [thread:$0]  %s2148_s5, 2048, %s59_s12, [#allocation9], %s2006_s3, %s2006_s3, %s2007_s14  }
  0x46   :  { %1990 = dma.done.wait [#allocation3], 128  }
  0x47   :  { %1991 = vsyncadd [#allocation3], 4294967168 }
  0x48   :  { %1992 = dma.done.wait [#allocation6], 14336  }
  0x49   :  { %1993 = vsyncadd [#allocation6], 4294952960 }
  0x4a   :  { %1994 = dma.done.wait [#allocation9], 2048  }
  0x4b   :  { %1995 = vsyncadd [#allocation9], 4294965248  ;;  %v2008_v0 = vmov 0   ;;  %v1692_v1 = vld [vmem:[#allocation5 + $0x4] ss:$28 sps:$4 sm:$0xff]   ;;  %v78_v32 = vld [vmem:[#allocation2] sm:$0xff] }
  0x4c   :  { %501 = vmatprep.mubr.bf16.mxu0 %v2008_v0  ;;  %542 = vmatprep.mubr.bf16.mxu1 %v2008_v0  ;;  %v1694_v2 = vld [vmem:[#allocation5] ss:$28 sps:$4 sm:$0xff]   ;;  %v1695_v3 = vld [vmem:[#allocation5 + $0xc] ss:$28 sps:$4 sm:$0xff]   ;;  %v1700_v6 = vld [vmem:[#allocation5 + $0x38] ss:$28 sps:$4 sm:$0xff]   ;;  %v2097_v35 = vpack.c.bf16 %v78_v32, %v78_v32 }
  0x4d   :  { %469 = vmatprep.subr.bf16.mxu0 %v1692_v1  ;;  %v1697_v4 = vld [vmem:[#allocation5 + $0x8] ss:$28 sps:$4 sm:$0xff]   ;;  %v1698_v5 = vld [vmem:[#allocation5 + $0x3c] ss:$28 sps:$4 sm:$0xff]   ;;  %510 = vmatprep.subr.bf16.mxu1 %v1695_v3  ;;  %v1704_v9 = vld [vmem:[#allocation5 + $0x74] ss:$28 sps:$4 sm:$0xff]  }
  0x4e   :  { %470 = vmatpush1.bf16.msra.mxu0 %v1694_v2  ;;  %v1701_v7 = vld [vmem:[#allocation5 + $0x44] ss:$28 sps:$4 sm:$0xff]   ;;  %511 = vmatpush1.bf16.msra.mxu1 %v1697_v4  ;;  %v1706_v10 = vld [vmem:[#allocation5 + $0x70] ss:$28 sps:$4 sm:$0xff]   ;;  %v1707_v11 = vld [vmem:[#allocation5 + $0x7c] ss:$28 sps:$4 sm:$0xff]  }
  0x4f   :  { %471 = vmatprep.subr.bf16.mxu0 %v1698_v5  ;;  %v1703_v8 = vld [vmem:[#allocation5 + $0x40] ss:$28 sps:$4 sm:$0xff]   ;;  %512 = vmatprep.subr.bf16.mxu1 %v1701_v7  ;;  %v1710_v12 = vld [vmem:[#allocation5 + $0xac] ss:$28 sps:$4 sm:$0xff]   ;;  %v1709_v13 = vld [vmem:[#allocation5 + $0x78] ss:$28 sps:$4 sm:$0xff]  }
  0x50   :  { %v1713_v14 = vld [vmem:[#allocation5 + $0xb4] ss:$28 sps:$4 sm:$0xff]   ;;  %v1712_v15 = vld [vmem:[#allocation5 + $0xa8] ss:$28 sps:$4 sm:$0xff]   ;;  %v1718_v19 = vld [vmem:[#allocation5 + $0xe0] ss:$28 sps:$4 sm:$0xff]  }
  0x51   :  { %v1716_v16 = vld [vmem:[#allocation5 + $0xe4] ss:$28 sps:$4 sm:$0xff]   ;;  %v1715_v17 = vld [vmem:[#allocation5 + $0xb0] ss:$28 sps:$4 sm:$0xff]   ;;  %v1722_v20 = vld [vmem:[#allocation5 + $0x11c] ss:$28 sps:$4 sm:$0xff]  }
  0x52   :  { %472 = vmatpush1.bf16.msra.mxu0 %v1700_v6  ;;  %513 = vmatpush1.bf16.msra.mxu1 %v1703_v8  ;;  %v1719_v18 = vld [vmem:[#allocation5 + $0xec] ss:$28 sps:$4 sm:$0xff]   ;;  %v1725_v22 = vld [vmem:[#allocation5 + $0x124] ss:$28 sps:$4 sm:$0xff]   ;;  %v1724_v23 = vld [vmem:[#allocation5 + $0x118] ss:$28 sps:$4 sm:$0xff]  }
  0x53   :  { %473 = vmatprep.subr.bf16.mxu0 %v1704_v9  ;;  %514 = vmatprep.subr.bf16.mxu1 %v1707_v11  ;;  %v1721_v21 = vld [vmem:[#allocation5 + $0xe8] ss:$28 sps:$4 sm:$0xff]   ;;  %v1728_v24 = vld [vmem:[#allocation5 + $0x154] ss:$28 sps:$4 sm:$0xff]   ;;  %v1727_v25 = vld [vmem:[#allocation5 + $0x120] ss:$28 sps:$4 sm:$0xff]  }
  0x54   :  { %v1731_v26 = vld [vmem:[#allocation5 + $0x15c] ss:$28 sps:$4 sm:$0xff]   ;;  %v1730_v27 = vld [vmem:[#allocation5 + $0x150] ss:$28 sps:$4 sm:$0xff]   ;;  %v1736_v30 = vld [vmem:[#allocation5 + $0x188] ss:$28 sps:$4 sm:$0xff]  }
  0x55   :  { %v1734_v28 = vld [vmem:[#allocation5 + $0x18c] ss:$28 sps:$4 sm:$0xff]   ;;  %v1733_v29 = vld [vmem:[#allocation5 + $0x158] ss:$28 sps:$4 sm:$0xff]   ;;  %v2009_v39 = vmov 0.0   ;;  %vm2010_vm0 = vmmov 0  }
  0x56   :  { %474 = vmatpush1.bf16.msra.mxu0 %v1706_v10  ;;  %515 = vmatpush1.bf16.msra.mxu1 %v1709_v13  ;;  %v1737_v31 = vld [vmem:[#allocation5 + $0x194] ss:$28 sps:$4 sm:$0xff]   ;;  %v1745_v37 = vld [vmem:[#allocation5 + $0x4c] ss:$28 sps:$4 sm:$0xff]   ;;  %v1749_v41 = vld [vmem:[#allocation5 + $0x84] ss:$28 sps:$4 sm:$0xff]  }
  0x57   :  { %475 = vmatprep.subr.bf16.mxu0 %v1710_v12  ;;  %516 = vmatprep.subr.bf16.mxu1 %v1713_v14  ;;  %v1742_v33 = vld [vmem:[#allocation5 + $0x14] ss:$28 sps:$4 sm:$0xff]   ;;  %v1743_v40 = vld [vmem:[#allocation5 + $0x48] ss:$28 sps:$4 sm:$0xff]   ;;  %v1747_v43 = vld [vmem:[#allocation5 + $0x80] ss:$28 sps:$4 sm:$0xff]  }
  0x58   :  { %v1739_v34 = vld [vmem:[#allocation5 + $0x190] ss:$28 sps:$4 sm:$0xff]   ;;  %v1746_v38 = vld [vmem:[#allocation5 + $0x18] ss:$28 sps:$4 sm:$0xff]   ;;  %v1754_v45 = vld [vmem:[#allocation5 + $0x88] ss:$28 sps:$4 sm:$0xff]  }
  0x59   :  { %v1740_v36 = vld [vmem:[#allocation5 + $0x10] ss:$28 sps:$4 sm:$0xff]   ;;  %v1753_v44 = vld [vmem:[#allocation5 + $0xbc] ss:$28 sps:$4 sm:$0xff]   ;;  %v1759_v52 = vld [vmem:[#allocation5 + $0x128] ss:$28 sps:$4 sm:$0xff]  }
  0x5a   :  { %476 = vmatpush1.bf16.msra.mxu0 %v1712_v15  ;;  %517 = vmatpush1.bf16.msra.mxu1 %v1715_v17  ;;  %v1750_v42 = vld [vmem:[#allocation5 + $0x50] ss:$28 sps:$4 sm:$0xff]   ;;  %v1751_v46 = vld [vmem:[#allocation5 + $0xb8] ss:$28 sps:$4 sm:$0xff]   ;;  %v1758_v48 = vld [vmem:[#allocation5 + $0xc0] ss:$28 sps:$4 sm:$0xff]  }
  0x5b   :  { %477 = vmatprep.subr.bf16.mxu0 %v1716_v16  ;;  %518 = vmatprep.subr.bf16.mxu1 %v1719_v18  ;;  %v1757_v47 = vld [vmem:[#allocation5 + $0xf4] ss:$28 sps:$4 sm:$0xff]   ;;  %v1761_v50 = vld [vmem:[#allocation5 + $0x12c] ss:$28 sps:$4 sm:$0xff]   ;;  %v1765_v53 = vld [vmem:[#allocation5 + $0x164] ss:$28 sps:$4 sm:$0xff]  }
  0x5c   :  { %v1755_v49 = vld [vmem:[#allocation5 + $0xf0] ss:$28 sps:$4 sm:$0xff]   ;;  %v1762_v51 = vld [vmem:[#allocation5 + $0xf8] ss:$28 sps:$4 sm:$0xff]   ;;  %v1763_v55 = vld [vmem:[#allocation5 + $0x160] ss:$28 sps:$4 sm:$0xff]  }
  0x5d   :  { %v1766_v54 = vld [vmem:[#allocation5 + $0x130] ss:$28 sps:$4 sm:$0xff]   ;;  %v1769_v56 = vld [vmem:[#allocation5 + $0x19c] ss:$28 sps:$4 sm:$0xff]   ;;  %v1770_v57 = vld [vmem:[#allocation5 + $0x168] ss:$28 sps:$4 sm:$0xff]  }
  0x5e   :  { %478 = vmatpush1.bf16.msra.mxu0 %v1718_v19  ;;  %519 = vmatpush1.bf16.msra.mxu1 %v1721_v21  ;;  %v1767_v58 = vld [vmem:[#allocation5 + $0x198] ss:$28 sps:$4 sm:$0xff]   ;;  %v1772_v59 = vld [vmem:[#allocation7 + $0x40] sm:$0xff]   ;;  %v1776_v1 = vld [vmem:[#allocation7 + $0x48] sm:$0xff]  }
  0x5f   :  { %479 = vmatprep.subr.bf16.mxu0 %v1722_v20  ;;  %520 = vmatprep.subr.bf16.mxu1 %v1725_v22  ;;  %v1771_v60 = vld [vmem:[#allocation5 + $0x1a0] ss:$28 sps:$4 sm:$0xff]   ;;  %v1777_v2 = vld [vmem:[#allocation7 + $0x8] sm:$0xff]   ;;  %v1780_v5 = vld [vmem:[#allocation7 + $0x50] sm:$0xff]  }
  0x60   :  { %v1774_v61 = vld [vmem:[#allocation7 + $0xc0] sm:$0xff]   ;;  %v1778_v3 = vld [vmem:[#allocation7 + $0xc8] sm:$0xff]   ;;  %v1781_v6 = vld [vmem:[#allocation7 + $0x10] sm:$0xff]  }
  0x61   :  { %v1773_v62 = vld [vmem:[#allocation7] sm:$0xff]   ;;  %v1779_v4 = vld [vmem:[#allocation7 + $0x88] sm:$0xff]   ;;  %v1782_v7 = vld [vmem:[#allocation7 + $0xd0] sm:$0xff]  }
  0x62   :  { %480 = vmatpush1.bf16.msra.mxu0 %v1724_v23  ;;  %521 = vmatpush1.bf16.msra.mxu1 %v1727_v25  ;;  %v1775_v63 = vld [vmem:[#allocation7 + $0x80] sm:$0xff]   ;;  %v1783_v8 = vld [vmem:[#allocation7 + $0x90] sm:$0xff]   ;;  %v1784_v9 = vld [vmem:[#allocation7 + $0x58] sm:$0xff]  }
  0x63   :  { %481 = vmatprep.subr.bf16.mxu0 %v1728_v24  ;;  %522 = vmatprep.subr.bf16.mxu1 %v1731_v26  ;;  %v1785_v10 = vld [vmem:[#allocation7 + $0x18] sm:$0xff]   ;;  %v1788_v13 = vld [vmem:[#allocation7 + $0x60] sm:$0xff]   ;;  %v1792_v17 = vld [vmem:[#allocation7 + $0x68] sm:$0xff]  }
  0x64   :  { %v1786_v11 = vld [vmem:[#allocation7 + $0xd8] sm:$0xff]   ;;  %v1789_v14 = vld [vmem:[#allocation7 + $0x20] sm:$0xff]   ;;  %v1793_v18 = vld [vmem:[#allocation7 + $0x28] sm:$0xff]  }
  0x65   :  { %v1787_v12 = vld [vmem:[#allocation7 + $0x98] sm:$0xff]   ;;  %v1790_v15 = vld [vmem:[#allocation7 + $0xe0] sm:$0xff]   ;;  %v1794_v19 = vld [vmem:[#allocation7 + $0xe8] sm:$0xff]  }
  0x66   :  { %482 = vmatpush1.bf16.msra.mxu0 %v1730_v27  ;;  %523 = vmatpush1.bf16.msra.mxu1 %v1733_v29  ;;  %v1791_v16 = vld [vmem:[#allocation7 + $0xa0] sm:$0xff]   ;;  %v1795_v20 = vld [vmem:[#allocation7 + $0xa8] sm:$0xff]   ;;  %v1796_v21 = vld [vmem:[#allocation7 + $0x70] sm:$0xff]  }
  0x67   :  { %483 = vmatprep.subr.bf16.mxu0 %v1734_v28  ;;  %524 = vmatprep.subr.bf16.mxu1 %v1737_v31  ;;  %v1797_v22 = vld [vmem:[#allocation7 + $0x30] sm:$0xff]   ;;  %v1800_v25 = vld [vmem:[#allocation7 + $0x78] sm:$0xff]   ;;  %v1804_v29 = vld [vmem:[#allocation7 + $0x140] sm:$0xff]  }
  0x68   :  { %v1798_v23 = vld [vmem:[#allocation7 + $0xf0] sm:$0xff]   ;;  %v1801_v26 = vld [vmem:[#allocation7 + $0x38] sm:$0xff]  }
  0x69   :  { %v1799_v24 = vld [vmem:[#allocation7 + $0xb0] sm:$0xff]   ;;  %v1802_v27 = vld [vmem:[#allocation7 + $0xf8] sm:$0xff]  }
  0x6a   :  { %484 = vmatpush1.bf16.msra.mxu0 %v1736_v30  ;;  %525 = vmatpush1.bf16.msra.mxu1 %v1739_v34  ;;  %v1803_v28 = vld [vmem:[#allocation7 + $0xb8] sm:$0xff]   ;;  %v146_v30 = vlaneseq }
  0x6b   :  { %551 = vmatprep.subr.bf16.mxu0 %v1742_v33  ;;  %1638 = vmatprep.subr.bf16.mxu1 %v2009_v39  ;;  %v144_v33 = vld [vmem:[%s2145_s2] sm:$0xff] }
  0x6c   :  { %v147_v31 = vshrl.u32 %v146_v30, 7  ;;  %v1816_v30 = vld [vmem:[#allocation7 + $0x160] sm:$0xff]  }
  0x6d   :  { %502 = vmatmul.mubr.bf16.vlgmr.msra.gmra.mrb[0].mxu0 %v2097_v35  ;;  %543 = vmatmul.mubr.bf16.vlgmr.msra.gmra.mrb[0].mxu1 %v2097_v35 }
  0x6e   :  { %552 = vmatpush1.bf16.msra.mxu0 %v1740_v36  ;;  %583 = vmatprep.mubr.bf16.mxu0 %v2008_v0  ;;  %v148_v32 = vsub.s32 0, %v147_v31  ;;  %v152_v34 = vsub.s32 1, %v147_v31  ;;  %v160_v36 = vsub.s32 3, %v147_v31 }
  0x6f   :  { %553 = vmatprep.subr.bf16.mxu0 %v1745_v37  ;;  %1639 = vmatpush3.bf16.msra.mxu1 %v1746_v38 }
  0x70   :  { %1654 = vmatprep.mubr.msk.bf16.mxu1 %vm2010_vm0, %v2009_v39  ;;  %1640 = vmatprep.subr.bf16.mxu1 %v2009_v39  ;;  %v149_v37 = vrot.slane %v144_v33, %v148_v32  ;;  %v153_v38 = vrot.slane %v144_v33, %v152_v34  ;;  %v1817_v32 = vld [vmem:[#allocation7 + $0x120] sm:$0xff]  }
  0x71   :  { %v1818_v34 = vld [vmem:[#allocation7 + $0x1a0] sm:$0xff]  }
  0x72   :  { %554 = vmatpush1.bf16.msra.mxu0 %v1743_v40 }
  0x73   :  { %555 = vmatprep.subr.bf16.mxu0 %v1749_v41  ;;  %1641 = vmatpush3.bf16.msra.mxu1 %v1750_v42  ;;  %v161_v42 = vrot.slane %v144_v33, %v160_v36 }
  0x74   :  { %1642 = vmatprep.subr.bf16.mxu1 %v2009_v39 }
  0x76   :  { %556 = vmatpush1.bf16.msra.mxu0 %v1747_v43 }
  0x77   :  { %557 = vmatprep.subr.bf16.mxu0 %v1753_v44  ;;  %1643 = vmatpush3.bf16.msra.mxu1 %v1754_v45 }
  0x78   :  { %1644 = vmatprep.subr.bf16.mxu1 %v2009_v39 }
  0x7a   :  { %558 = vmatpush1.bf16.msra.mxu0 %v1751_v46 }
  0x7b   :  { %559 = vmatprep.subr.bf16.mxu0 %v1757_v47  ;;  %1645 = vmatpush3.bf16.msra.mxu1 %v1758_v48 }
  0x7c   :  { %1646 = vmatprep.subr.bf16.mxu1 %v2009_v39 }
  0x7e   :  { %560 = vmatpush1.bf16.msra.mxu0 %v1755_v49 }
  0x7f   :  { %561 = vmatprep.subr.bf16.mxu0 %v1761_v50  ;;  %1647 = vmatpush3.bf16.msra.mxu1 %v1762_v51 }
  0x80   :  { %1648 = vmatprep.subr.bf16.mxu1 %v2009_v39 }
  0x82   :  { %562 = vmatpush1.bf16.msra.mxu0 %v1759_v52 }
  0x83   :  { %563 = vmatprep.subr.bf16.mxu0 %v1765_v53  ;;  %1649 = vmatpush3.bf16.msra.mxu1 %v1766_v54 }
  0x84   :  { %1650 = vmatprep.subr.bf16.mxu1 %v2009_v39 }
  0x86   :  { %564 = vmatpush1.bf16.msra.mxu0 %v1763_v55 }
  0x87   :  { %565 = vmatprep.subr.bf16.mxu0 %v1769_v56  ;;  %1651 = vmatpush3.bf16.msra.mxu1 %v1770_v57 }
  0x88   :  { %1652 = vmatprep.subr.bf16.mxu1 %v2009_v39 }
  0x8a   :  { %566 = vmatpush1.bf16.msra.mxu0 %v1767_v58 }
  0x8b   :  { %1563 = vmatprep.subr.bf16.mxu0 %v1772_v59  ;;  %1653 = vmatpush3.bf16.msra.mxu1 %v1771_v60 }
  0x8c   :  { %1585 = vmatprep.subr.bf16.mxu1 %v1774_v61  ;;  %v164_v61 = vsub.s32 4, %v147_v31 }
  0x8d   :  { %584 = vmatmul.mubr.bf16.vlgmr.msra.gmra.mrb[4].mxu0 %v2097_v35 }
  0x8e   :  { %1564 = vmatpush3.bf16.msra.mxu0 %v1773_v62  ;;  %1655 = vmatmul.mubr.bf16.vlgmr.msra.gmra.mrb[4].mxu1 %v2097_v35  ;;  %v156_v35 = vsub.s32 2, %v147_v31 }
  0x8f   :  { %1586 = vmatpush3.bf16.msra.mxu1 %v1775_v63  ;;  %1565 = vmatprep.subr.bf16.mxu0 %v1776_v1  ;;  %v1805_v1 = vld [vmem:[#allocation7 + $0x100] sm:$0xff]  }
  0x90   :  { %1587 = vmatprep.subr.bf16.mxu1 %v1778_v3  ;;  %v157_v40 = vrot.slane %v144_v33, %v156_v35 }
  0x92   :  { %1566 = vmatpush3.bf16.msra.mxu0 %v1777_v2  ;;  %v168_v2 = vsub.s32 5, %v147_v31 }
  0x93   :  { %1588 = vmatpush3.bf16.msra.mxu1 %v1779_v4  ;;  %1567 = vmatprep.subr.bf16.mxu0 %v1780_v5  ;;  %v1807_v5 = vld [vmem:[#allocation7 + $0x148] sm:$0xff]  }
  0x94   :  { %1589 = vmatprep.subr.bf16.mxu1 %v1782_v7 }
  0x96   :  { %1568 = vmatpush3.bf16.msra.mxu0 %v1781_v6  ;;  %v172_v6 = vsub.s32 6, %v147_v31  ;;  %v1815_v31 = vld [vmem:[#allocation7 + $0x198] sm:$0xff]  }
  0x97   :  { %1590 = vmatpush3.bf16.msra.mxu1 %v1783_v8  ;;  %1569 = vmatprep.subr.bf16.mxu0 %v1784_v9  ;;  %v1806_v8 = vld [vmem:[#allocation7 + $0x180] sm:$0xff]   ;;  %v165_v9 = vrot.slane %v144_v33, %v164_v61 }
  0x98   :  { %1591 = vmatprep.subr.bf16.mxu1 %v1786_v11  ;;  %v1808_v11 = vld [vmem:[#allocation7 + $0x108] sm:$0xff]  }
  0x99   :  { %v1840_v61 = vld [vmem:[#allocation8 + $0x40] ss:$8 sps:$4 sm:$0xff]  }
  0x9a   :  { %1570 = vmatpush3.bf16.msra.mxu0 %v1785_v10  ;;  %v169_v10 = vrot.slane %v144_v33, %v168_v2  ;;  %v1851_v2 = vld [vmem:[#allocation8 + $0x74] ss:$8 sps:$4 sm:$0xff]  }
  0x9b   :  { %1592 = vmatpush3.bf16.msra.mxu1 %v1787_v12  ;;  %1571 = vmatprep.subr.bf16.mxu0 %v1788_v13  ;;  %v173_v12 = vrot.slane %v144_v33, %v172_v6  ;;  %v1810_v13 = vld [vmem:[#allocation7 + $0x150] sm:$0xff]   ;;  %v1819_v33 = vld [vmem:[#allocation7 + $0x168] sm:$0xff]  }
  0x9c   :  { %1593 = vmatprep.subr.bf16.mxu1 %v1790_v15  ;;  %v1809_v15 = vld [vmem:[#allocation7 + $0x188] sm:$0xff]  }
  0x9e   :  { %1572 = vmatpush3.bf16.msra.mxu0 %v1789_v14 }
  0x9f   :  { %1594 = vmatpush3.bf16.msra.mxu1 %v1791_v16  ;;  %1573 = vmatprep.subr.bf16.mxu0 %v1792_v17 }
  0xa0   :  { %1595 = vmatprep.subr.bf16.mxu1 %v1794_v19 }
  0xa2   :  { %1574 = vmatpush3.bf16.msra.mxu0 %v1793_v18 }
  0xa3   :  { %1596 = vmatpush3.bf16.msra.mxu1 %v1795_v20  ;;  %1575 = vmatprep.subr.bf16.mxu0 %v1796_v21  ;;  %v1811_v21 = vld [vmem:[#allocation7 + $0x110] sm:$0xff]  }
  0xa4   :  { %1597 = vmatprep.subr.bf16.mxu1 %v1798_v23 }
  0xa6   :  { %1576 = vmatpush3.bf16.msra.mxu0 %v1797_v22 }
  0xa7   :  { %1598 = vmatpush3.bf16.msra.mxu1 %v1799_v24  ;;  %1577 = vmatprep.subr.bf16.mxu0 %v1800_v25  ;;  %v1813_v25 = vld [vmem:[#allocation7 + $0x158] sm:$0xff]  }
  0xa8   :  { %1599 = vmatprep.subr.bf16.mxu1 %v1802_v27  ;;  %v1812_v27 = vld [vmem:[#allocation7 + $0x190] sm:$0xff]  }
  0xaa   :  { %1578 = vmatpush3.bf16.msra.mxu0 %v1801_v26 }
  0xab   :  { %1600 = vmatpush3.bf16.msra.mxu1 %v1803_v28  ;;  %1607 = vmatprep.subr.bf16.mxu0 %v1804_v29  ;;  %v1814_v29 = vld [vmem:[#allocation7 + $0x118] sm:$0xff]  }
  0xac   :  { %1658 = vmatprep.subr.bf16.mxu1 %v2009_v39 }
 0x140   :  { %v503_v41 = vpop.f32.mrb[0].mxu0  ;;  %v544_v46 = vpop.f32.mrb[0].mxu1 }
 0x141   :  { %v504_v43 = vadd.f32 %v503_v41, %v149_v37  ;;  %v505_v44 = vpop.f32.mrb[1].mxu0  ;;  %v545_v48 = vadd.f32 %v544_v46, %v157_v40  ;;  %v546_v49 = vpop.f32.mrb[1].mxu1  ;;  %v1820_v37 = vld [vmem:[#allocation7 + $0x128] sm:$0xff]   ;;  %v1822_v40 = vld [vmem:[#allocation7 + $0x170] sm:$0xff]  }
 0x142   :  { %v506_v45 = vadd.f32 %v505_v44, %v153_v38  ;;  %v507_v47 = vpop.f32.mrb[2].mxu0  ;;  %v547_v51 = vadd.f32 %v546_v49, %v161_v42  ;;  %v548_v52 = vpop.f32.mrb[2].mxu1  ;;  %v1821_v41 = vld [vmem:[#allocation7 + $0x1a8] sm:$0xff]   ;;  %v1823_v42 = vld [vmem:[#allocation7 + $0x130] sm:$0xff]  }
 0x143   :  { %1852 = vtanh.f32 %v504_v43  ;;  %v508_v50 = vpop.f32.mrb[3].mxu0  ;;  %v549_v53 = vpop.f32.mrb[3].mxu1  ;;  %v1825_v43 = vld [vmem:[#allocation7 + $0x178] sm:$0xff]   ;;  %v1824_v44 = vld [vmem:[#allocation7 + $0x1b0] sm:$0xff]  }
 0x144   :  { %1854 = vtanh.f32 %v506_v45  ;;  %v1826_v45 = vld [vmem:[#allocation7 + $0x138] sm:$0xff]   ;;  %v1828_v53 = vld [vmem:[#allocation8] ss:$8 sps:$4 sm:$0xff]  }
 0x145   :  { %1856 = vtanh.f32 %v545_v48  ;;  %v1827_v47 = vld [vmem:[#allocation7 + $0x1b8] sm:$0xff]  }
 0x146   :  { %1858 = vtanh.f32 %v547_v51 }
 0x14d   :  { %v1853_v54 = vpop.eup %1852 }
 0x14e   :  { %v1855_v55 = vpop.eup %1854  ;;  %1860 = vtanh.f32 %v1853_v54  ;;  %v1830_v54 = vld [vmem:[#allocation8 + $0x4] ss:$8 sps:$4 sm:$0xff]  }
 0x14f   :  { %v1857_v56 = vpop.eup %1856  ;;  %1862 = vtanh.f32 %v1855_v55  ;;  %v1833_v55 = vld [vmem:[#allocation8 + $0x14] ss:$8 sps:$4 sm:$0xff]  }
 0x150   :  { %v1859_v57 = vpop.eup %1858  ;;  %1864 = vtanh.f32 %v1857_v56  ;;  %v1831_v56 = vld [vmem:[#allocation8 + $0x10] ss:$8 sps:$4 sm:$0xff]  }
 0x151   :  { %1866 = vtanh.f32 %v1859_v57  ;;  %v1836_v57 = vld [vmem:[#allocation8 + $0x24] ss:$8 sps:$4 sm:$0xff]  }
 0x158   :  { %v1861_v58 = vpop.eup %1860 }
 0x159   :  { %v1863_v59 = vpop.eup %1862  ;;  %v646_v60 = vpack.c.bf16 %v1861_v58, %v1861_v58  ;;  %v1839_v58 = vld [vmem:[#allocation8 + $0x34] ss:$8 sps:$4 sm:$0xff]  }
 0x15a   :  { %v1865_v62 = vpop.eup %1864  ;;  %v647_v63 = vpack.c.bf16 %v1863_v59, %v1863_v59  ;;  %v1837_v59 = vld [vmem:[#allocation8 + $0x30] ss:$8 sps:$4 sm:$0xff]  }
 0x15b   :  { %v1867_v3 = vpop.eup %1866  ;;  %v648_v4 = vpack.c.bf16 %v1865_v62, %v1865_v62  ;;  %v1843_v62 = vld [vmem:[#allocation8 + $0x50] ss:$8 sps:$4 sm:$0xff]  }
 0x15c   :  { %1140 = vmatprep.mubr.bf16.mxu0 %v647_v63  ;;  %v649_v7 = vpack.c.bf16 %v1867_v3, %v1867_v3  ;;  %v1848_v63 = vld [vmem:[#allocation8 + $0x64] ss:$8 sps:$4 sm:$0xff]   ;;  %v1849_v3 = vld [vmem:[#allocation8 + $0x70] ss:$8 sps:$4 sm:$0xff]  }
 0x15d   :  { %1141 = vmatmul.mubr.bf16.vlgmr.msra.gmra.mrb[8].mxu0 %v646_v60  ;;  %v1842_v60 = vld [vmem:[#allocation8 + $0x44] ss:$8 sps:$4 sm:$0xff]  }
 0x15e   :  { %1180 = vmatprep.mubr.bf16.mxu1 %v649_v7  ;;  %1608 = vmatpush3.bf16.msra.mxu0 %v1805_v1  ;;  %v1846_v1 = vld [vmem:[#allocation8 + $0x60] ss:$8 sps:$4 sm:$0xff]  }
 0x15f   :  { %1181 = vmatmul.mubr.bf16.vlgmr.msra.gmra.mrb[8].mxu1 %v648_v4  ;;  %1609 = vmatprep.subr.bf16.mxu0 %v1807_v5  ;;  %v1481_v5 = vld [vmem:[%s2147_s4] ss:$0 sm:$0xff]  ;;  %s2011_s4 = smov [#allocation10]  }
 0x160   :  { %v585_v14 = vpop.f32.mrb[4].mxu0  ;;  %1659 = vmatpush3.bf16.msra.mxu1 %v1806_v8  ;;  %1674 = vmatprep.mubr.msk.bf16.mxu1 %vm2010_vm0, %v2009_v39  ;;  %s1414_s25 = sshll.u32 %s2011_s4, 4  ;;  %s1415_s25 = int_to_ptr.vmem [resolvable:$true] %s1414_s25 }
 0x161   :  { %v586_v16 = vadd.f32 %v585_v14, %v165_v9  ;;  %v587_v17 = vpop.f32.mrb[5].mxu0  ;;  %1660 = vmatprep.subr.bf16.mxu1 %v2009_v39  ;;  %v626_v20 = vpop.f32.mrb[4].mxu1  ;;  %s1968_s26 = scalar_lea.vmem %s1415_s25, 256  ;;  %p1973_p5 = scmp.lt.s32.totalorder %s1415_s25, %s1415_s25 }
 0x162   :  { %v588_v18 = vadd.f32 %v587_v17, %v169_v10  ;;  %v589_v19 = vpop.f32.mrb[6].mxu0  ;;  %1610 = vmatpush3.bf16.msra.mxu0 %v1808_v11  ;;  %v627_v23 = vadd.f32 %v626_v20, %v173_v12  ;;  %v1656_v24 = vpop.f32.mrb[5].mxu1  ;;  %p1969_p4 = scmp.ne.s32.totalorder %s1415_s25, %s1968_s26  ;;  %p1974_p6 = scmp.lt.s32.totalorder %s1968_s26, %s1968_s26 }
 0x163   :  { %1868 = vtanh.f32 %v586_v16  ;;  %v590_v22 = vpop.f32.mrb[7].mxu0  ;;  %1611 = vmatprep.subr.bf16.mxu0 %v1810_v13  ;;  %v629_v26 = vpop.f32.mrb[6].mxu1 }
 0x164   :  { %1870 = vtanh.f32 %v588_v18  ;;  %1661 = vmatpush3.bf16.msra.mxu1 %v1809_v15  ;;  %v1657_v28 = vpop.f32.mrb[7].mxu1  ;;  %p1975_p7 = por %p1974_p6, %p1973_p5 }
 0x165   :  { %1872 = vtanh.f32 %v627_v23  ;;  %1662 = vmatprep.subr.bf16.mxu1 %v2009_v39 }
 0x166   :  { %1612 = vmatpush3.bf16.msra.mxu0 %v1811_v21  ;;  %p1976_p8 = pnand %p1975_p7, %p1969_p4 }
 0x167   :  { %1613 = vmatprep.subr.bf16.mxu0 %v1813_v25 }
 0x168   :  { %1663 = vmatpush3.bf16.msra.mxu1 %v1812_v27 }
 0x169   :  { %1664 = vmatprep.subr.bf16.mxu1 %v2009_v39 }
 0x16a   :  { %1614 = vmatpush3.bf16.msra.mxu0 %v1814_v29 }
 0x16b   :  { %1615 = vmatprep.subr.bf16.mxu0 %v1816_v30 }
 0x16c   :  { %1665 = vmatpush3.bf16.msra.mxu1 %v1815_v31 }
 0x16d   :  { %v1869_v35 = vpop.eup %1868  ;;  %1666 = vmatprep.subr.bf16.mxu1 %v2009_v39 }
 0x16e   :  { %v1871_v36 = vpop.eup %1870  ;;  %1874 = vtanh.f32 %v1869_v35  ;;  %1616 = vmatpush3.bf16.msra.mxu0 %v1817_v32 }
 0x16f   :  { %v1873_v38 = vpop.eup %1872  ;;  %1876 = vtanh.f32 %v1871_v36  ;;  %1617 = vmatprep.subr.bf16.mxu0 %v1819_v33 }
 0x170   :  { %1878 = vtanh.f32 %v1873_v38  ;;  %1667 = vmatpush3.bf16.msra.mxu1 %v1818_v34 }
 0x171   :  { %1668 = vmatprep.subr.bf16.mxu1 %v2009_v39 }
 0x172   :  { %1618 = vmatpush3.bf16.msra.mxu0 %v1820_v37 }
 0x173   :  { %1619 = vmatprep.subr.bf16.mxu0 %v1822_v40 }
 0x174   :  { %1669 = vmatpush3.bf16.msra.mxu1 %v1821_v41 }
 0x175   :  { %1670 = vmatprep.subr.bf16.mxu1 %v2009_v39 }
 0x176   :  { %1620 = vmatpush3.bf16.msra.mxu0 %v1823_v42 }
 0x177   :  { %1621 = vmatprep.subr.bf16.mxu0 %v1825_v43 }
 0x178   :  { %v1875_v46 = vpop.eup %1874  ;;  %1671 = vmatpush3.bf16.msra.mxu1 %v1824_v44 }
 0x179   :  { %v1877_v48 = vpop.eup %1876  ;;  %1672 = vmatprep.subr.bf16.mxu1 %v2009_v39  ;;  %v650_v51 = vpack.c.bf16 %v1875_v46, %v1875_v46  ;;  %v1834_v39 = vld [vmem:[#allocation8 + $0x20] ss:$8 sps:$4 sm:$0xff]  }
 0x17a   :  { %v1879_v49 = vpop.eup %1878  ;;  %1622 = vmatpush3.bf16.msra.mxu0 %v1826_v45  ;;  %v651_v50 = vpack.c.bf16 %v1877_v48, %v1877_v48 }
 0x17b   :  { %v652_v52 = vpack.c.bf16 %v1879_v49, %v1879_v49  ;;  %1365 = vmatprep.subr.bf16.mxu0 %v1830_v54 }
 0x17c   :  { %1220 = vmatprep.mubr.bf16.mxu0 %v651_v50  ;;  %1673 = vmatpush3.bf16.msra.mxu1 %v1827_v47 }
 0x17d   :  { %1221 = vmatmul.mubr.bf16.vlgmr.msra.gmra.mrb[12].mxu0 %v650_v51 }
 0x17e   :  { %1397 = vmatprep.mubr.bf16.mxu0 %v2008_v0  ;;  %1366 = vmatpush1.bf16.msra.mxu0 %v1828_v53  ;;  %v1845_v0 = vld [vmem:[#allocation8 + $0x54] ss:$8 sps:$4 sm:$0xff]  }
 0x17f   :  { %1675 = vmatmul.mubr.bf16.vlgmr.msra.gmra.mrb[12].mxu1 %v652_v52  ;;  %1367 = vmatprep.subr.bf16.mxu0 %v1833_v55 }
 0x182   :  { %1368 = vmatpush1.bf16.msra.mxu0 %v1831_v56 }
 0x183   :  { %1369 = vmatprep.subr.bf16.mxu0 %v1836_v57 }
 0x186   :  { %1370 = vmatpush1.bf16.msra.mxu0 %v1834_v39 }
 0x187   :  { %1371 = vmatprep.subr.bf16.mxu0 %v1839_v58 }
 0x18a   :  { %1372 = vmatpush1.bf16.msra.mxu0 %v1837_v59 }
 0x18b   :  { %1373 = vmatprep.subr.bf16.mxu0 %v1842_v60 }
 0x18e   :  { %1374 = vmatpush1.bf16.msra.mxu0 %v1840_v61 }
 0x18f   :  { %1375 = vmatprep.subr.bf16.mxu0 %v1845_v0 }
 0x192   :  { %1376 = vmatpush1.bf16.msra.mxu0 %v1843_v62 }
 0x193   :  { %1377 = vmatprep.subr.bf16.mxu0 %v1848_v63 }
 0x196   :  { %1378 = vmatpush1.bf16.msra.mxu0 %v1846_v1 }
 0x197   :  { %1379 = vmatprep.subr.bf16.mxu0 %v1851_v2 }
 0x19a   :  { %1380 = vmatpush1.bf16.msra.mxu0 %v1849_v3 }
 0x230   :  { %v1579_v4 = vpop.f32.mrb[8].mxu0 }
 0x231   :  { %v1580_v6 = vpop.f32.mrb[9].mxu0 }
 0x232   :  { %v1581_v7 = vadd.f32 %v1580_v6, %v1579_v4  ;;  %v1601_v8 = vpop.f32.mrb[8].mxu1  ;;  %v1582_v9 = vpop.f32.mrb[10].mxu0 }
 0x233   :  { %v1602_v10 = vpop.f32.mrb[9].mxu1  ;;  %v1583_v11 = vpop.f32.mrb[11].mxu0 }
 0x234   :  { %v1143_v12 = vadd.f32 %v1581_v7, %v1481_v5  ;;  %v1603_v13 = vadd.f32 %v1602_v10, %v1601_v8  ;;  %v1604_v14 = vpop.f32.mrb[10].mxu1 }
 0x235   :  { %v1605_v15 = vpop.f32.mrb[11].mxu1 }
 0x236   :  { %v1183_v16 = vadd.f32 %v1603_v13, %v1143_v12 }
 0x250   :  { %v1623_v17 = vpop.f32.mrb[12].mxu0 }
 0x251   :  { %v1624_v18 = vpop.f32.mrb[13].mxu0 }
 0x252   :  { %v1625_v19 = vadd.f32 %v1624_v18, %v1623_v17  ;;  %v1626_v20 = vpop.f32.mrb[14].mxu0  ;;  %v1262_v21 = vpop.f32.mrb[12].mxu1 }
 0x253   :  { %v1627_v22 = vpop.f32.mrb[15].mxu0  ;;  %v1676_v23 = vpop.f32.mrb[13].mxu1 }
 0x254   :  { %v1223_v24 = vadd.f32 %v1625_v19, %v1183_v16  ;;  %v1265_v25 = vpop.f32.mrb[14].mxu1 }
 0x255   :  { %v1677_v26 = vpop.f32.mrb[15].mxu1 }
 0x256   :  { %v1263_v27 = vadd.f32 %v1262_v21, %v1223_v24 }
 0x258   :  { %v1268_v28 = vpack.c.bf16 %v1263_v27, %v1263_v27 }
 0x25a   :  { %1398 = vmatmul.mubr.bf16.vlgmr.msra.gmra.mrb[16].mxu0 %v1268_v28 }
 0x32d   :  { %v1399_v29 = vpop.f32.mrb[16].mxu0 }
 0x32e   :  { %1406 = vst [vmem:[#allocation10] sm:$0xff] %v1399_v29  ;;  %v1401_v30 = vpop.f32.mrb[17].mxu0 }
 0x32f   :  { %1407 = vst [vmem:[#allocation10 + $0x8] sm:$0xff] %v1401_v30  ;;  %v1403_v31 = vpop.f32.mrb[18].mxu0 }
 0x330   :  { %v1404_v32 = vpop.f32.mrb[19].mxu0 }
 0x331   :  { %1979 = shalt.err (!%p1976_p8)
}
 0x332   :  { %s1980_s29 = scalar_lea.hbm %s2149_s6, 256 }
 0x333   :  { %p1981_p9 = scmp.ne.s32.totalorder %s2149_s6, %s1980_s29  ;;  %p1984_p10 = scmp.lt.u32.totalorder %s1980_s29, %s2149_s6 }
 0x335   :  { %p1986_p11 = pnand %p1984_p10, %p1981_p9 }
 0x337   :  { %1989 = shalt.err (!%p1986_p11)
}
 0x338   :  { %1417 = dma.vmem_to_hbm [thread:$0]  %s1415_s25, 256, %s2149_s6, [#allocation4]  }
 0x339   :  { %1996 = dma.done.wait [#allocation4], 256  }
 0x33a   :  { %1997 = vsyncadd [#allocation4], 4294967040 }
 0x33b   :  { %1421 = vsyncpa [#allocation3], 1 }
 0x33c   :  { %1422 = vsyncpa [#allocation6], 1 }
 0x33d   :  { %1423 = vsyncpa [#allocation9], 1 }
 0x33e   :  { %1424 = vsyncpa [#allocation4], 1 }

</bundles_post_ra>
